<compile_context>
chip_gen: v7x
topology: tpu7x:2x2x1
jax: 0.10.0
libtpu: 0.0.40
codegen_flags: <defaults>
</compile_context>

<pallas_src>
import functools

import jax
import jax.numpy as jnp
from jax.experimental import pallas as pl
from jax.experimental.pallas import tpu as pltpu


# Set True (EUP reciprocal) only after validating recurrence drift tolerance.
_APPROX_GATE_SIGMOID = False


def _round_up(x, m):
    return ((x + m - 1) // m) * m


def _vmem_limit_bytes():
    """Generation-keyed VMEM budget: v7x has 64 MiB per TensorCore,
    v5e/v6e have 128 MiB -> request well under the physical ceiling."""
    cap = 64 * 1024 * 1024
    try:
        info = pltpu.get_tpu_info()
        cap = int(getattr(info, "vmem_capacity_bytes", cap))
    except Exception:
        pass
    if cap <= 64 * 1024 * 1024:          # v7x (per-TC)
        return 48 * 1024 * 1024
    return 100 * 1024 * 1024             # v5e / v6e


def _pick_time_block(S, N, din, H, P, vmem_limit):
    """Largest divisor of S whose per-step VMEM footprint fits the budget."""
    # bytes per unit of TS: double-buffered bf16 input block + bf16 output
    # block + bf16 zin scratch.
    per_ts = 4 * P * N * din + 4 * N * H + 8 * N * H
    # resident weights (bf16, double-buffer-worst-case) + h/c scratch + slack.
    fixed = 4 * (P * din * 4 * H + H * 4 * H) + 6 * N * H + 256 * 1024
    budget = int(vmem_limit * 0.6)
    best = 1
    for ts in range(1, min(S, 512) + 1):
        if S % ts == 0 and ts * per_ts + fixed <= budget:
            best = ts
    return best


# -----------------------------------------------------------------------------
# Pallas kernel: one direction x one time-block of an LSTM layer.
# Grid = (direction, time_block).  PyTorch gate order (i, f, g, o).
# -----------------------------------------------------------------------------
def _make_dir_lstm_kernel(ts, n, h, p_slabs, din_slab, unroll):
    G = 4 * h

    def kernel(x_ref, w_ih_ref, w_hh_ref, b_ref, o_ref, zin_sc, h_sc, c_sc):
        # x_ref:    [P, TS, N, Din] bf16   (time-major input slabs)
        # w_ih_ref: [P, Din, 4H]    bf16   (this direction, per-slab, transposed)
        # w_hh_ref: [H, 4H]         bf16   (this direction, transposed)
        # b_ref:    [1, 4H]         f32    (b_ih + b_hh, this direction)
        # o_ref:    [TS, N, H]      bf16   (this direction's output block)
        # zin_sc:   [TS, N, 4H]     bf16   (hoisted gate inputs)
        # h_sc:     [N, H]          bf16   (carried hidden state)
        # c_sc:     [N, H]          f32    (carried cell state)
        d = pl.program_id(0)
        t_blk = pl.program_id(1)

        @pl.when(t_blk == 0)
        def _():
            h_sc[...] = jnp.zeros_like(h_sc)
            c_sc[...] = jnp.zeros_like(c_sc)

        # ---- hoisted input projection for this time block (all slabs). -----
        acc = jnp.dot(x_ref[0].reshape(ts * n, din_slab), w_ih_ref[0],
                      preferred_element_type=jnp.float32)
        for p in range(1, p_slabs):
            acc = acc + jnp.dot(x_ref[p].reshape(ts * n, din_slab), w_ih_ref[p],
                                preferred_element_type=jnp.float32)
        acc = acc + b_ref[...]
        zin_sc[...] = acc.reshape(ts, n, G).astype(jnp.bfloat16)

        w_hh = w_hh_ref[...]

        def sigmoid(v):
            return pl.reciprocal(1.0 + jnp.exp(-v), approx=_APPROX_GATE_SIGMOID)

        def step(i, carry):
            # forward (d==0): local time i ; backward (d==1): local TS-1-i.
            t_local = i + d * (ts - 1 - 2 * i)
            # Only the h @ W_hh recurrence sits on the serial critical path.
            z = zin_sc[t_local].astype(jnp.float32) + jnp.dot(
                h_sc[...], w_hh, preferred_element_type=jnp.float32)
            i_g = sigmoid(z[:, 0:h])
            f_g = sigmoid(z[:, h:2 * h])
            g_g = jnp.tanh(z[:, 2 * h:3 * h])
            o_g = sigmoid(z[:, 3 * h:4 * h])
            c_new = f_g * c_sc[...] + i_g * g_g
            h_new = o_g * jnp.tanh(c_new)
            h_bf = h_new.astype(jnp.bfloat16)
            c_sc[...] = c_new
            h_sc[...] = h_bf
            o_ref[t_local] = h_bf
            return carry

        jax.lax.fori_loop(0, ts, step, 0, unroll=unroll)

    return kernel


def _bilstm_layer(x_slabs, p, *, vmem_limit):
    """One bidirectional LSTM layer.
    x_slabs: [P, S, N, Din_slab] bf16 -> [2, S, N, H] bf16 (fwd, bwd)."""
    P, S, N, din = x_slabs.shape
    H = p['w_hh'].shape[1]
    ts = _pick_time_block(S, N, din, H, P, vmem_limit)
    n_t = S // ts
    unroll = ts if ts <= 16 else 8
    kernel = _make_dir_lstm_kernel(ts, N, H, P, din, unroll)

    def tmap(d, t):
        # forward (d==0): block t ; backward (d==1): block n_t-1-t.
        return t + d * (n_t - 1 - 2 * t)

    return pl.pallas_call(
        kernel,
        out_shape=jax.ShapeDtypeStruct((2, S, N, H), jnp.bfloat16),
        grid=(2, n_t),
        in_specs=[
            pl.BlockSpec((P, ts, N, din),
                         lambda d, t: (0, tmap(d, t), 0, 0)),
            pl.BlockSpec((pl.Squeezed(), P, din, 4 * H),
                         lambda d, t: (d, 0, 0, 0)),
            pl.BlockSpec((pl.Squeezed(), H, 4 * H),
                         lambda d, t: (d, 0, 0)),
            pl.BlockSpec((pl.Squeezed(), 1, 4 * H),
                         lambda d, t: (d, 0, 0)),
        ],
        out_specs=pl.BlockSpec((pl.Squeezed(), ts, N, H),
                               lambda d, t: (d, tmap(d, t), 0, 0)),
        scratch_shapes=[
            pltpu.VMEM((ts, N, 4 * H), jnp.bfloat16),   # hoisted gate inputs
            pltpu.VMEM((N, H), jnp.bfloat16),           # carried h
            pltpu.VMEM((N, H), jnp.float32),            # carried c
        ],
        compiler_params=pltpu.CompilerParams(
            dimension_semantics=("parallel", "arbitrary"),
            vmem_limit_bytes=vmem_limit),
    )(x_slabs, p['w_ih'], p['w_hh'], p['b'])


# -----------------------------------------------------------------------------
# Pallas kernel: classification head + weighted cross-entropy loss.
# -----------------------------------------------------------------------------
def _head_kernel(a_ref, b_ref, oh_ref, w1t_ref, b1_ref, w2t_ref, b2_ref,
                 cw_ref, logits_ref, loss_ref, *, negative_slope):
    A = a_ref[...].astype(jnp.float32)                    # [B, D]
    Bv = b_ref[...].astype(jnp.float32)                   # [B, D]
    pres = jnp.concatenate([A, Bv, A - Bv, A * Bv], axis=1)        # [B, 4D]
    h = jnp.dot(pres.astype(jnp.bfloat16), w1t_ref[...],
                preferred_element_type=jnp.float32) + b1_ref[...]   # [B, M2]
    h = jnp.where(h >= 0.0, h, negative_slope * h)                  # LeakyReLU
    logits = jnp.dot(h.astype(jnp.bfloat16), w2t_ref[...],
                     preferred_element_type=jnp.float32) + b2_ref[...]
    logits_ref[...] = logits

    # Weighted cross entropy (nn.CrossEntropyLoss(weight=...), mean reduction):
    # loss = sum_i w[y_i] * (-log_softmax(logits_i)[y_i]) / sum_i w[y_i]
    m = jnp.max(logits, axis=1, keepdims=True)
    lse = m + jnp.log(jnp.sum(jnp.exp(logits - m), axis=1, keepdims=True))
    logp = logits - lse
    onehot = oh_ref[...]                                           # [B, C]
    picked = jnp.sum(onehot * logp, axis=1, keepdims=True)         # [B, 1]
    w_y = jnp.sum(onehot * cw_ref[...], axis=1, keepdims=True)     # [B, 1]
    loss_ref[0, 0] = -jnp.sum(w_y * picked) / jnp.sum(w_y)


def head_forward(out_A, out_B, params, labels, *, negative_slope=0.2):
    Bsz = out_A.shape[0]
    C = params['fc2_w_t'].shape[1]
    onehot = jax.nn.one_hot(labels, C, dtype=jnp.float32)
    kernel = functools.partial(_head_kernel, negative_slope=negative_slope)
    logits, loss = pl.pallas_call(
        kernel,
        out_shape=(jax.ShapeDtypeStruct((Bsz, C), jnp.float32),
                   jax.ShapeDtypeStruct((1, 1), jnp.float32)),
        in_specs=[pl.BlockSpec(memory_space=pltpu.MemorySpace.VMEM)] * 8,
        out_specs=(pl.BlockSpec(memory_space=pltpu.MemorySpace.VMEM),
                   pl.BlockSpec(memory_space=pltpu.MemorySpace.SMEM)),
        compiler_params=pltpu.CompilerParams(vmem_limit_bytes=32 * 1024 * 1024),
    )(out_A, out_B, onehot, params['fc1_w_t'], params['fc1_b'],
      params['fc2_w_t'], params['fc2_b'], params['class_weights'])
    return logits, loss[0, 0]


# -----------------------------------------------------------------------------
# Plain-JAX glue: deterministic encoder stand-in (time-major, bf16 output).
# -----------------------------------------------------------------------------
def encoder_stub_tm(tokens, emb_table, pos_table):
    # TODO(synk): full pretrained 12-layer RoBERTa encoder not reproduced;
    # deterministic embedding + positional embedding + LayerNorm stand-in.
    tok_tm = tokens.T                                 # [S, N]
    h = emb_table[tok_tm] + pos_table[:, None, :]     # [S, N, D]
    mu = jnp.mean(h, axis=-1, keepdims=True)
    var = jnp.var(h, axis=-1, keepdims=True)
    h = (h - mu) / jnp.sqrt(var + 1e-5)
    return h.astype(jnp.bfloat16)[None]               # [1, S, N, D] bf16


def eci_roberta_forward(params, x_sent, y_sent, x_position, y_position, xy):
    B = x_sent.shape[0]
    # Fuse both sentences along the batch axis -> one encoder pass, one
    # pallas_call per LSTM layer (weights resident in VMEM across the grid).
    tokens = jnp.concatenate([x_sent, y_sent], axis=0)            # [2B, S]
    N = tokens.shape[0]
    n_pad = _round_up(N, 8)       # lane/sublane-friendly batch padding
    if n_pad != N:
        tokens = jnp.pad(tokens, ((0, n_pad - N), (0, 0)))
    x_slabs = encoder_stub_tm(tokens, params['emb'], params['pos'])
    # dropout(0.5) and LSTM inter-layer dropout(0.6) -> identity (eval).
    vmem_limit = _vmem_limit_bytes()
    out = x_slabs                                                 # [1,S,Np,D]
    for layer in params['lstm']:
        out = _bilstm_layer(out, layer, vmem_limit=vmem_limit)    # [2,S,Np,H]
    # Event-token gather: concat fwd/bwd halves -> matches torch [fwd|bwd].
    idx = jnp.arange(B)
    out_f, out_b = out[0], out[1]
    out_A = jnp.concatenate([out_f[x_position, idx, :],
                             out_b[x_position, idx, :]], axis=-1)     # [B, D]
    out_B = jnp.concatenate([out_f[y_position, idx + B, :],
                             out_b[y_position, idx + B, :]], axis=-1)  # [B, D]
    logits, loss = head_forward(out_A, out_B, params, xy, negative_slope=0.2)
    return logits, loss


# -----------------------------------------------------------------------------
# Deterministic parameter construction (weights pre-transposed / pre-fused,
# matmul operands stored in bfloat16, biases / cell math in f32).
# -----------------------------------------------------------------------------
def init_params(key, *, vocab, seq, D, H, mlp_size, num_classes):
    keys = iter(jax.random.split(key, 64))

    def w(shape, scale=0.1):
        return (scale * jax.random.normal(next(keys), shape)).astype(jnp.float32)

    params = {'emb': w((vocab, D)), 'pos': w((seq, D))}

    # LSTM: 2 layers, bidirectional, hidden = H = D // 2.
    lstm = []
    for layer in range(2):
        if layer == 0:
            P, din_slab = 1, D           # layer 0 input: encoder output
        else:
            P, din_slab = 2, H           # layer 1 input: [fwd|bwd] slabs
        w_ih_dirs, w_hh_dirs, b_dirs = [], [], []
        for _dir in range(2):
            w_ih = w((4 * H, P * din_slab))
            w_hh = w((4 * H, H))
            b_ih = w((4 * H,))
            b_hh = w((4 * H,))
            slabs = [w_ih[:, p * din_slab:(p + 1) * din_slab].T
                     for p in range(P)]                       # each [din, 4H]
            w_ih_dirs.append(jnp.stack(slabs, axis=0))        # [P, din, 4H]
            w_hh_dirs.append(w_hh.T)                          # [H, 4H]
            b_dirs.append((b_ih + b_hh)[None, :])             # [1, 4H]
        lstm.append({
            'w_ih': jnp.stack(w_ih_dirs, 0).astype(jnp.bfloat16),  # [2,P,din,4H]
            'w_hh': jnp.stack(w_hh_dirs, 0).astype(jnp.bfloat16),  # [2,H,4H]
            'b':    jnp.stack(b_dirs, 0),                          # [2,1,4H] f32
        })
    params['lstm'] = lstm

    # sub=True, mul=True branch: fc1 (4D -> 2*mlp), fc2 (2*mlp -> C).
    fc1_w = w((mlp_size * 2, D * 4)); fc1_b = w((mlp_size * 2,))
    fc2_w = w((num_classes, mlp_size * 2)); fc2_b = w((num_classes,))
    params['fc1_w_t'] = fc1_w.T.astype(jnp.bfloat16)     # [4D, 2*mlp]
    params['fc1_b'] = fc1_b[None, :]
    params['fc2_w_t'] = fc2_w.T.astype(jnp.bfloat16)     # [2*mlp, C]
    params['fc2_b'] = fc2_b[None, :]
    # MATRES class weights from the module __init__.
    params['class_weights'] = jnp.array(
        [6404.0 / 3233, 6404.0 / 2263, 6404.0 / 232, 6404.0 / 676],
        dtype=jnp.float32)[None, :]
    return params


if __name__ == "__main__":
    key = jax.random.PRNGKey(0)
    B, S, D = 2, 8, 32          # batch, seq length, "roberta_dim" stand-in
    H = D // 2                  # LSTM hidden per direction
    MLP = 16                    # mlp_size
    C = 4                       # num_classes (MATRES)
    VOCAB = 50

    k_par, k_xs, k_ys, k_xp, k_yp, k_xy = jax.random.split(key, 6)
    params = init_params(k_par, vocab=VOCAB, seq=S, D=D, H=H,
                         mlp_size=MLP, num_classes=C)

    x_sent = jax.random.randint(k_xs, (B, S), 0, VOCAB, dtype=jnp.int32)
    y_sent = jax.random.randint(k_ys, (B, S), 0, VOCAB, dtype=jnp.int32)
    x_position = jax.random.randint(k_xp, (B,), 0, S, dtype=jnp.int32)
    y_position = jax.random.randint(k_yp, (B,), 0, S, dtype=jnp.int32)
    xy = jax.random.randint(k_xy, (B,), 0, C, dtype=jnp.int32)

    logits, loss = eci_roberta_forward(params, x_sent, y_sent,
                                       x_position, y_position, xy)
    jax.block_until_ready((logits, loss))
    assert logits.shape == (B, C)
    assert loss.shape == ()
    print("KERNEL_OK")
</pallas_src>

<mosaic_0001>
module attributes {stable_mosaic.version = 11 : i64} {
  func.func @kernel(%arg0: i32, %arg1: i32, %arg2: memref<1x8x8x32xbf16, #tpu.memory_space<vmem>>, %arg3: memref<1x1x32x64xbf16, #tpu.memory_space<vmem>>, %arg4: memref<1x16x64xbf16, #tpu.memory_space<vmem>>, %arg5: memref<1x1x64xf32, #tpu.memory_space<vmem>>, %arg6: memref<1x8x8x16xbf16, #tpu.memory_space<vmem>>, %arg7: memref<8x8x64xbf16, #tpu.memory_space<vmem>>, %arg8: memref<8x16xbf16, #tpu.memory_space<vmem>>, %arg9: memref<8x16xf32, #tpu.memory_space<vmem>>) attributes {dimension_semantics = [#tpu.dimension_semantics<parallel>, #tpu.dimension_semantics<arbitrary>], iteration_bounds = array<i64: 2, 1>, scalar_prefetch = 0 : i64, scratch_operands = 3 : i64, tpu.core_type = #tpu.core_type<tc>, window_params = [{transform_indices = @transform_0, window_bounds = array<i64: 1, 8, 8, 32>}, {transform_indices = @transform_1, window_bounds = array<i64: 1, 1, 32, 64>}, {transform_indices = @transform_2, window_bounds = array<i64: 1, 16, 64>}, {transform_indices = @transform_3, window_bounds = array<i64: 1, 1, 64>}, {transform_indices = @transform_4, window_bounds = array<i64: 1, 8, 8, 16>}]} {
    %c0_i32 = arith.constant 0 : i32
    %0 = arith.cmpi eq, %arg1, %c0_i32 : i32
    %1 = arith.extui %0 : i1 to i32
    %c0_i32_0 = arith.constant 0 : i32
    %2 = arith.cmpi ne, %1, %c0_i32_0 : i32
    scf.if %2 {
      %cst_194 = arith.constant 0.000000e+00 : bf16
      %394 = vector.broadcast %cst_194 : bf16 to vector<8x16xbf16>
      %c0_195 = arith.constant 0 : index
      %c0_196 = arith.constant 0 : index
      %395 = vector.load %arg8[%c0_195, %c0_196] : memref<8x16xbf16, #tpu.memory_space<vmem>>, vector<8x16xbf16>
      tpu.vector_store %arg8[%c0_195, %c0_196], %394 {strides = array<i32>} : memref<8x16xbf16, #tpu.memory_space<vmem>>, vector<8x16xbf16>,
      %cst_197 = arith.constant 0.000000e+00 : f32
      %396 = vector.broadcast %cst_197 : f32 to vector<8x16xf32>
      %c0_198 = arith.constant 0 : index
      %c0_199 = arith.constant 0 : index
      %397 = vector.load %arg9[%c0_198, %c0_199] : memref<8x16xf32, #tpu.memory_space<vmem>>, vector<8x16xf32>
      tpu.vector_store %arg9[%c0_198, %c0_199], %396 {strides = array<i32>} : memref<8x16xf32, #tpu.memory_space<vmem>>, vector<8x16xf32>,
    } else {
    }
    %c0 = arith.constant 0 : index
    %c0_1 = arith.constant 0 : index
    %c0_2 = arith.constant 0 : index
    %c0_3 = arith.constant 0 : index
    %3 = vector.load %arg2[%c0, %c0_1, %c0_2, %c0_3] : memref<1x8x8x32xbf16, #tpu.memory_space<vmem>>, vector<1x8x8x32xbf16>
    %4 = vector.shape_cast %3 : vector<1x8x8x32xbf16> to vector<8x8x32xbf16>
    %5 = vector.shape_cast %4 : vector<8x8x32xbf16> to vector<64x32xbf16>
    %c0_4 = arith.constant 0 : index
    %c0_5 = arith.constant 0 : index
    %c0_6 = arith.constant 0 : index
    %c0_7 = arith.constant 0 : index
    %6 = vector.load %arg3[%c0_4, %c0_5, %c0_6, %c0_7] : memref<1x1x32x64xbf16, #tpu.memory_space<vmem>>, vector<1x1x32x64xbf16>
    %7 = vector.shape_cast %6 : vector<1x1x32x64xbf16> to vector<32x64xbf16>
    %cst = arith.constant dense<0.000000e+00> : vector<64x64xf32>
    %8 = tpu.matmul %5, %7, %cst {dimension_numbers = #tpu.dot_dimension_numbers<[1], [0], [0], [1], [0, 0, 1, 1], [], []>} : vector<64x32xbf16>, vector<32x64xbf16>, vector<64x64xf32> -> vector<64x64xf32>
    %c0_8 = arith.constant 0 : index
    %c0_9 = arith.constant 0 : index
    %c0_10 = arith.constant 0 : index
    %9 = vector.load %arg5[%c0_8, %c0_9, %c0_10] : memref<1x1x64xf32, #tpu.memory_space<vmem>>, vector<1x1x64xf32>
    %10 = vector.shape_cast %9 : vector<1x1x64xf32> to vector<1x64xf32>
    %11 = vector.broadcast %10 : vector<1x64xf32> to vector<64x64xf32>
    %12 = arith.addf %8, %11 : vector<64x64xf32>
    %13 = vector.shape_cast %12 : vector<64x64xf32> to vector<8x8x64xf32>
    %14 = arith.truncf %13 : vector<8x8x64xf32> to vector<8x8x64xbf16>
    %c0_11 = arith.constant 0 : index
    %c0_12 = arith.constant 0 : index
    %c0_13 = arith.constant 0 : index
    %15 = vector.load %arg7[%c0_11, %c0_12, %c0_13] : memref<8x8x64xbf16, #tpu.memory_space<vmem>>, vector<8x8x64xbf16>
    tpu.vector_store %arg7[%c0_11, %c0_12, %c0_13], %14 {strides = array<i32>} : memref<8x8x64xbf16, #tpu.memory_space<vmem>>, vector<8x8x64xbf16>,
    %c0_14 = arith.constant 0 : index
    %c0_15 = arith.constant 0 : index
    %c0_16 = arith.constant 0 : index
    %16 = vector.load %arg4[%c0_14, %c0_15, %c0_16] : memref<1x16x64xbf16, #tpu.memory_space<vmem>>, vector<1x16x64xbf16>
    %17 = vector.shape_cast %16 : vector<1x16x64xbf16> to vector<16x64xbf16>
    %c0_i32_17 = arith.constant 0 : i32
    %c2_i32 = arith.constant 2 : i32
    %18 = arith.muli %c2_i32, %c0_i32_17 : i32
    %c7_i32 = arith.constant 7 : i32
    %19 = arith.subi %c7_i32, %18 : i32
    %20 = arith.muli %arg0, %19 : i32
    %21 = arith.addi %c0_i32_17, %20 : i32
    %22 = arith.index_cast %21 : i32 to index
    %c0_18 = arith.constant 0 : index
    %c0_19 = arith.constant 0 : index
    %23 = vector.load %arg7[%22, %c0_18, %c0_19] : memref<8x8x64xbf16, #tpu.memory_space<vmem>>, vector<1x8x64xbf16>
    %24 = vector.shape_cast %23 : vector<1x8x64xbf16> to vector<8x64xbf16>
    %25 = arith.extf %24 : vector<8x64xbf16> to vector<8x64xf32>
    %c0_20 = arith.constant 0 : index
    %c0_21 = arith.constant 0 : index
    %26 = vector.load %arg8[%c0_20, %c0_21] : memref<8x16xbf16, #tpu.memory_space<vmem>>, vector<8x16xbf16>
    %cst_22 = arith.constant dense<0.000000e+00> : vector<8x64xf32>
    %27 = tpu.matmul %26, %17, %cst_22 {dimension_numbers = #tpu.dot_dimension_numbers<[1], [0], [0], [1], [0, 0, 1, 1], [], []>} : vector<8x16xbf16>, vector<16x64xbf16>, vector<8x64xf32> -> vector<8x64xf32>
    %28 = arith.addf %25, %27 : vector<8x64xf32>
    %29 = vector.extract_strided_slice %28 {offsets = [0, 0], sizes = [8, 16], strides = [1, 1]} : vector<8x64xf32> to vector<8x16xf32>
    %cst_23 = arith.constant 0.000000e+00 : f32
    %30 = vector.broadcast %cst_23 : f32 to vector<8x16xf32>
    %31 = arith.subf %30, %29 : vector<8x16xf32>
    %32 = math.exp %31 : vector<8x16xf32>
    %cst_24 = arith.constant 1.000000e+00 : f32
    %33 = vector.broadcast %cst_24 : f32 to vector<8x16xf32>
    %34 = arith.addf %33, %32 : vector<8x16xf32>
    %35 = tpu.reciprocal %34 : vector<8x16xf32> -> vector<8x16xf32>
    %36 = vector.extract_strided_slice %28 {offsets = [0, 16], sizes = [8, 16], strides = [1, 1]} : vector<8x64xf32> to vector<8x16xf32>
    %cst_25 = arith.constant 0.000000e+00 : f32
    %37 = vector.broadcast %cst_25 : f32 to vector<8x16xf32>
    %38 = arith.subf %37, %36 : vector<8x16xf32>
    %39 = math.exp %38 : vector<8x16xf32>
    %cst_26 = arith.constant 1.000000e+00 : f32
    %40 = vector.broadcast %cst_26 : f32 to vector<8x16xf32>
    %41 = arith.addf %40, %39 : vector<8x16xf32>
    %42 = tpu.reciprocal %41 : vector<8x16xf32> -> vector<8x16xf32>
    %43 = vector.extract_strided_slice %28 {offsets = [0, 32], sizes = [8, 16], strides = [1, 1]} : vector<8x64xf32> to vector<8x16xf32>
    %44 = math.tanh %43 : vector<8x16xf32>
    %45 = vector.extract_strided_slice %28 {offsets = [0, 48], sizes = [8, 16], strides = [1, 1]} : vector<8x64xf32> to vector<8x16xf32>
    %cst_27 = arith.constant 0.000000e+00 : f32
    %46 = vector.broadcast %cst_27 : f32 to vector<8x16xf32>
    %47 = arith.subf %46, %45 : vector<8x16xf32>
    %48 = math.exp %47 : vector<8x16xf32>
    %cst_28 = arith.constant 1.000000e+00 : f32
    %49 = vector.broadcast %cst_28 : f32 to vector<8x16xf32>
    %50 = arith.addf %49, %48 : vector<8x16xf32>
    %51 = tpu.reciprocal %50 : vector<8x16xf32> -> vector<8x16xf32>
    %c0_29 = arith.constant 0 : index
    %c0_30 = arith.constant 0 : index
    %52 = vector.load %arg9[%c0_29, %c0_30] : memref<8x16xf32, #tpu.memory_space<vmem>>, vector<8x16xf32>
    %53 = arith.mulf %42, %52 : vector<8x16xf32>
    %54 = arith.mulf %35, %44 : vector<8x16xf32>
    %55 = arith.addf %53, %54 : vector<8x16xf32>
    %56 = math.tanh %55 : vector<8x16xf32>
    %57 = arith.mulf %51, %56 : vector<8x16xf32>
    %58 = arith.truncf %57 : vector<8x16xf32> to vector<8x16xbf16>
    %c0_31 = arith.constant 0 : index
    %c0_32 = arith.constant 0 : index
    %59 = vector.load %arg9[%c0_31, %c0_32] : memref<8x16xf32, #tpu.memory_space<vmem>>, vector<8x16xf32>
    tpu.vector_store %arg9[%c0_31, %c0_32], %55 {strides = array<i32>} : memref<8x16xf32, #tpu.memory_space<vmem>>, vector<8x16xf32>,
    %c0_33 = arith.constant 0 : index
    %c0_34 = arith.constant 0 : index
    %60 = vector.load %arg8[%c0_33, %c0_34] : memref<8x16xbf16, #tpu.memory_space<vmem>>, vector<8x16xbf16>
    tpu.vector_store %arg8[%c0_33, %c0_34], %58 {strides = array<i32>} : memref<8x16xbf16, #tpu.memory_space<vmem>>, vector<8x16xbf16>,
    %c0_35 = arith.constant 0 : index
    %61 = arith.index_cast %21 : i32 to index
    %c0_36 = arith.constant 0 : index
    %c0_37 = arith.constant 0 : index
    %62 = vector.load %arg6[%c0_35, %61, %c0_36, %c0_37] : memref<1x8x8x16xbf16, #tpu.memory_space<vmem>>, vector<1x1x8x16xbf16>
    %63 = vector.shape_cast %62 : vector<1x1x8x16xbf16> to vector<8x16xbf16>
    %64 = vector.shape_cast %58 : vector<8x16xbf16> to vector<1x1x8x16xbf16>
    tpu.vector_store %arg6[%c0_35, %61, %c0_36, %c0_37], %64 {strides = array<i32>} : memref<1x8x8x16xbf16, #tpu.memory_space<vmem>>, vector<1x1x8x16xbf16>,
    %c1_i32 = arith.constant 1 : i32
    %c2_i32_38 = arith.constant 2 : i32
    %65 = arith.muli %c2_i32_38, %c1_i32 : i32
    %c7_i32_39 = arith.constant 7 : i32
    %66 = arith.subi %c7_i32_39, %65 : i32
    %67 = arith.muli %arg0, %66 : i32
    %68 = arith.addi %c1_i32, %67 : i32
    %69 = arith.index_cast %68 : i32 to index
    %c0_40 = arith.constant 0 : index
    %c0_41 = arith.constant 0 : index
    %70 = vector.load %arg7[%69, %c0_40, %c0_41] : memref<8x8x64xbf16, #tpu.memory_space<vmem>>, vector<1x8x64xbf16>
    %71 = vector.shape_cast %70 : vector<1x8x64xbf16> to vector<8x64xbf16>
    %72 = arith.extf %71 : vector<8x64xbf16> to vector<8x64xf32>
    %c0_42 = arith.constant 0 : index
    %c0_43 = arith.constant 0 : index
    %73 = vector.load %arg8[%c0_42, %c0_43] : memref<8x16xbf16, #tpu.memory_space<vmem>>, vector<8x16xbf16>
    %cst_44 = arith.constant dense<0.000000e+00> : vector<8x64xf32>
    %74 = tpu.matmul %73, %17, %cst_44 {dimension_numbers = #tpu.dot_dimension_numbers<[1], [0], [0], [1], [0, 0, 1, 1], [], []>} : vector<8x16xbf16>, vector<16x64xbf16>, vector<8x64xf32> -> vector<8x64xf32>
    %75 = arith.addf %72, %74 : vector<8x64xf32>
    %76 = vector.extract_strided_slice %75 {offsets = [0, 0], sizes = [8, 16], strides = [1, 1]} : vector<8x64xf32> to vector<8x16xf32>
    %cst_45 = arith.constant 0.000000e+00 : f32
    %77 = vector.broadcast %cst_45 : f32 to vector<8x16xf32>
    %78 = arith.subf %77, %76 : vector<8x16xf32>
    %79 = math.exp %78 : vector<8x16xf32>
    %cst_46 = arith.constant 1.000000e+00 : f32
    %80 = vector.broadcast %cst_46 : f32 to vector<8x16xf32>
    %81 = arith.addf %80, %79 : vector<8x16xf32>
    %82 = tpu.reciprocal %81 : vector<8x16xf32> -> vector<8x16xf32>
    %83 = vector.extract_strided_slice %75 {offsets = [0, 16], sizes = [8, 16], strides = [1, 1]} : vector<8x64xf32> to vector<8x16xf32>
    %cst_47 = arith.constant 0.000000e+00 : f32
    %84 = vector.broadcast %cst_47 : f32 to vector<8x16xf32>
    %85 = arith.subf %84, %83 : vector<8x16xf32>
    %86 = math.exp %85 : vector<8x16xf32>
    %cst_48 = arith.constant 1.000000e+00 : f32
    %87 = vector.broadcast %cst_48 : f32 to vector<8x16xf32>
    %88 = arith.addf %87, %86 : vector<8x16xf32>
    %89 = tpu.reciprocal %88 : vector<8x16xf32> -> vector<8x16xf32>
    %90 = vector.extract_strided_slice %75 {offsets = [0, 32], sizes = [8, 16], strides = [1, 1]} : vector<8x64xf32> to vector<8x16xf32>
    %91 = math.tanh %90 : vector<8x16xf32>
    %92 = vector.extract_strided_slice %75 {offsets = [0, 48], sizes = [8, 16], strides = [1, 1]} : vector<8x64xf32> to vector<8x16xf32>
    %cst_49 = arith.constant 0.000000e+00 : f32
    %93 = vector.broadcast %cst_49 : f32 to vector<8x16xf32>
    %94 = arith.subf %93, %92 : vector<8x16xf32>
    %95 = math.exp %94 : vector<8x16xf32>
    %cst_50 = arith.constant 1.000000e+00 : f32
    %96 = vector.broadcast %cst_50 : f32 to vector<8x16xf32>
    %97 = arith.addf %96, %95 : vector<8x16xf32>
    %98 = tpu.reciprocal %97 : vector<8x16xf32> -> vector<8x16xf32>
    %c0_51 = arith.constant 0 : index
    %c0_52 = arith.constant 0 : index
    %99 = vector.load %arg9[%c0_51, %c0_52] : memref<8x16xf32, #tpu.memory_space<vmem>>, vector<8x16xf32>
    %100 = arith.mulf %89, %99 : vector<8x16xf32>
    %101 = arith.mulf %82, %91 : vector<8x16xf32>
    %102 = arith.addf %100, %101 : vector<8x16xf32>
    %103 = math.tanh %102 : vector<8x16xf32>
    %104 = arith.mulf %98, %103 : vector<8x16xf32>
    %105 = arith.truncf %104 : vector<8x16xf32> to vector<8x16xbf16>
    %c0_53 = arith.constant 0 : index
    %c0_54 = arith.constant 0 : index
    %106 = vector.load %arg9[%c0_53, %c0_54] : memref<8x16xf32, #tpu.memory_space<vmem>>, vector<8x16xf32>
    tpu.vector_store %arg9[%c0_53, %c0_54], %102 {strides = array<i32>} : memref<8x16xf32, #tpu.memory_space<vmem>>, vector<8x16xf32>,
    %c0_55 = arith.constant 0 : index
    %c0_56 = arith.constant 0 : index
    %107 = vector.load %arg8[%c0_55, %c0_56] : memref<8x16xbf16, #tpu.memory_space<vmem>>, vector<8x16xbf16>
    tpu.vector_store %arg8[%c0_55, %c0_56], %105 {strides = array<i32>} : memref<8x16xbf16, #tpu.memory_space<vmem>>, vector<8x16xbf16>,
    %c0_57 = arith.constant 0 : index
    %108 = arith.index_cast %68 : i32 to index
    %c0_58 = arith.constant 0 : index
    %c0_59 = arith.constant 0 : index
    %109 = vector.load %arg6[%c0_57, %108, %c0_58, %c0_59] : memref<1x8x8x16xbf16, #tpu.memory_space<vmem>>, vector<1x1x8x16xbf16>
    %110 = vector.shape_cast %109 : vector<1x1x8x16xbf16> to vector<8x16xbf16>
    %111 = vector.shape_cast %105 : vector<8x16xbf16> to vector<1x1x8x16xbf16>
    tpu.vector_store %arg6[%c0_57, %108, %c0_58, %c0_59], %111 {strides = array<i32>} : memref<1x8x8x16xbf16, #tpu.memory_space<vmem>>, vector<1x1x8x16xbf16>,
    %c2_i32_60 = arith.constant 2 : i32
    %c2_i32_61 = arith.constant 2 : i32
    %112 = arith.muli %c2_i32_61, %c2_i32_60 : i32
    %c7_i32_62 = arith.constant 7 : i32
    %113 = arith.subi %c7_i32_62, %112 : i32
    %114 = arith.muli %arg0, %113 : i32
    %115 = arith.addi %c2_i32_60, %114 : i32
    %116 = arith.index_cast %115 : i32 to index
    %c0_63 = arith.constant 0 : index
    %c0_64 = arith.constant 0 : index
    %117 = vector.load %arg7[%116, %c0_63, %c0_64] : memref<8x8x64xbf16, #tpu.memory_space<vmem>>, vector<1x8x64xbf16>
    %118 = vector.shape_cast %117 : vector<1x8x64xbf16> to vector<8x64xbf16>
    %119 = arith.extf %118 : vector<8x64xbf16> to vector<8x64xf32>
    %c0_65 = arith.constant 0 : index
    %c0_66 = arith.constant 0 : index
    %120 = vector.load %arg8[%c0_65, %c0_66] : memref<8x16xbf16, #tpu.memory_space<vmem>>, vector<8x16xbf16>
    %cst_67 = arith.constant dense<0.000000e+00> : vector<8x64xf32>
    %121 = tpu.matmul %120, %17, %cst_67 {dimension_numbers = #tpu.dot_dimension_numbers<[1], [0], [0], [1], [0, 0, 1, 1], [], []>} : vector<8x16xbf16>, vector<16x64xbf16>, vector<8x64xf32> -> vector<8x64xf32>
    %122 = arith.addf %119, %121 : vector<8x64xf32>
    %123 = vector.extract_strided_slice %122 {offsets = [0, 0], sizes = [8, 16], strides = [1, 1]} : vector<8x64xf32> to vector<8x16xf32>
    %cst_68 = arith.constant 0.000000e+00 : f32
    %124 = vector.broadcast %cst_68 : f32 to vector<8x16xf32>
    %125 = arith.subf %124, %123 : vector<8x16xf32>
    %126 = math.exp %125 : vector<8x16xf32>
    %cst_69 = arith.constant 1.000000e+00 : f32
    %127 = vector.broadcast %cst_69 : f32 to vector<8x16xf32>
    %128 = arith.addf %127, %126 : vector<8x16xf32>
    %129 = tpu.reciprocal %128 : vector<8x16xf32> -> vector<8x16xf32>
    %130 = vector.extract_strided_slice %122 {offsets = [0, 16], sizes = [8, 16], strides = [1, 1]} : vector<8x64xf32> to vector<8x16xf32>
    %cst_70 = arith.constant 0.000000e+00 : f32
    %131 = vector.broadcast %cst_70 : f32 to vector<8x16xf32>
    %132 = arith.subf %131, %130 : vector<8x16xf32>
    %133 = math.exp %132 : vector<8x16xf32>
    %cst_71 = arith.constant 1.000000e+00 : f32
    %134 = vector.broadcast %cst_71 : f32 to vector<8x16xf32>
    %135 = arith.addf %134, %133 : vector<8x16xf32>
    %136 = tpu.reciprocal %135 : vector<8x16xf32> -> vector<8x16xf32>
    %137 = vector.extract_strided_slice %122 {offsets = [0, 32], sizes = [8, 16], strides = [1, 1]} : vector<8x64xf32> to vector<8x16xf32>
    %138 = math.tanh %137 : vector<8x16xf32>
    %139 = vector.extract_strided_slice %122 {offsets = [0, 48], sizes = [8, 16], strides = [1, 1]} : vector<8x64xf32> to vector<8x16xf32>
    %cst_72 = arith.constant 0.000000e+00 : f32
    %140 = vector.broadcast %cst_72 : f32 to vector<8x16xf32>
    %141 = arith.subf %140, %139 : vector<8x16xf32>
    %142 = math.exp %141 : vector<8x16xf32>
    %cst_73 = arith.constant 1.000000e+00 : f32
    %143 = vector.broadcast %cst_73 : f32 to vector<8x16xf32>
    %144 = arith.addf %143, %142 : vector<8x16xf32>
    %145 = tpu.reciprocal %144 : vector<8x16xf32> -> vector<8x16xf32>
    %c0_74 = arith.constant 0 : index
    %c0_75 = arith.constant 0 : index
    %146 = vector.load %arg9[%c0_74, %c0_75] : memref<8x16xf32, #tpu.memory_space<vmem>>, vector<8x16xf32>
    %147 = arith.mulf %136, %146 : vector<8x16xf32>
    %148 = arith.mulf %129, %138 : vector<8x16xf32>
    %149 = arith.addf %147, %148 : vector<8x16xf32>
    %150 = math.tanh %149 : vector<8x16xf32>
    %151 = arith.mulf %145, %150 : vector<8x16xf32>
    %152 = arith.truncf %151 : vector<8x16xf32> to vector<8x16xbf16>
    %c0_76 = arith.constant 0 : index
    %c0_77 = arith.constant 0 : index
    %153 = vector.load %arg9[%c0_76, %c0_77] : memref<8x16xf32, #tpu.memory_space<vmem>>, vector<8x16xf32>
    tpu.vector_store %arg9[%c0_76, %c0_77], %149 {strides = array<i32>} : memref<8x16xf32, #tpu.memory_space<vmem>>, vector<8x16xf32>,
    %c0_78 = arith.constant 0 : index
    %c0_79 = arith.constant 0 : index
    %154 = vector.load %arg8[%c0_78, %c0_79] : memref<8x16xbf16, #tpu.memory_space<vmem>>, vector<8x16xbf16>
    tpu.vector_store %arg8[%c0_78, %c0_79], %152 {strides = array<i32>} : memref<8x16xbf16, #tpu.memory_space<vmem>>, vector<8x16xbf16>,
    %c0_80 = arith.constant 0 : index
    %155 = arith.index_cast %115 : i32 to index
    %c0_81 = arith.constant 0 : index
    %c0_82 = arith.constant 0 : index
    %156 = vector.load %arg6[%c0_80, %155, %c0_81, %c0_82] : memref<1x8x8x16xbf16, #tpu.memory_space<vmem>>, vector<1x1x8x16xbf16>
    %157 = vector.shape_cast %156 : vector<1x1x8x16xbf16> to vector<8x16xbf16>
    %158 = vector.shape_cast %152 : vector<8x16xbf16> to vector<1x1x8x16xbf16>
    tpu.vector_store %arg6[%c0_80, %155, %c0_81, %c0_82], %158 {strides = array<i32>} : memref<1x8x8x16xbf16, #tpu.memory_space<vmem>>, vector<1x1x8x16xbf16>,
    %c3_i32 = arith.constant 3 : i32
    %c2_i32_83 = arith.constant 2 : i32
    %159 = arith.muli %c2_i32_83, %c3_i32 : i32
    %c7_i32_84 = arith.constant 7 : i32
    %160 = arith.subi %c7_i32_84, %159 : i32
    %161 = arith.muli %arg0, %160 : i32
    %162 = arith.addi %c3_i32, %161 : i32
    %163 = arith.index_cast %162 : i32 to index
    %c0_85 = arith.constant 0 : index
    %c0_86 = arith.constant 0 : index
    %164 = vector.load %arg7[%163, %c0_85, %c0_86] : memref<8x8x64xbf16, #tpu.memory_space<vmem>>, vector<1x8x64xbf16>
    %165 = vector.shape_cast %164 : vector<1x8x64xbf16> to vector<8x64xbf16>
    %166 = arith.extf %165 : vector<8x64xbf16> to vector<8x64xf32>
    %c0_87 = arith.constant 0 : index
    %c0_88 = arith.constant 0 : index
    %167 = vector.load %arg8[%c0_87, %c0_88] : memref<8x16xbf16, #tpu.memory_space<vmem>>, vector<8x16xbf16>
    %cst_89 = arith.constant dense<0.000000e+00> : vector<8x64xf32>
    %168 = tpu.matmul %167, %17, %cst_89 {dimension_numbers = #tpu.dot_dimension_numbers<[1], [0], [0], [1], [0, 0, 1, 1], [], []>} : vector<8x16xbf16>, vector<16x64xbf16>, vector<8x64xf32> -> vector<8x64xf32>
    %169 = arith.addf %166, %168 : vector<8x64xf32>
    %170 = vector.extract_strided_slice %169 {offsets = [0, 0], sizes = [8, 16], strides = [1, 1]} : vector<8x64xf32> to vector<8x16xf32>
    %cst_90 = arith.constant 0.000000e+00 : f32
    %171 = vector.broadcast %cst_90 : f32 to vector<8x16xf32>
    %172 = arith.subf %171, %170 : vector<8x16xf32>
    %173 = math.exp %172 : vector<8x16xf32>
    %cst_91 = arith.constant 1.000000e+00 : f32
    %174 = vector.broadcast %cst_91 : f32 to vector<8x16xf32>
    %175 = arith.addf %174, %173 : vector<8x16xf32>
    %176 = tpu.reciprocal %175 : vector<8x16xf32> -> vector<8x16xf32>
    %177 = vector.extract_strided_slice %169 {offsets = [0, 16], sizes = [8, 16], strides = [1, 1]} : vector<8x64xf32> to vector<8x16xf32>
    %cst_92 = arith.constant 0.000000e+00 : f32
    %178 = vector.broadcast %cst_92 : f32 to vector<8x16xf32>
    %179 = arith.subf %178, %177 : vector<8x16xf32>
    %180 = math.exp %179 : vector<8x16xf32>
    %cst_93 = arith.constant 1.000000e+00 : f32
    %181 = vector.broadcast %cst_93 : f32 to vector<8x16xf32>
    %182 = arith.addf %181, %180 : vector<8x16xf32>
    %183 = tpu.reciprocal %182 : vector<8x16xf32> -> vector<8x16xf32>
    %184 = vector.extract_strided_slice %169 {offsets = [0, 32], sizes = [8, 16], strides = [1, 1]} : vector<8x64xf32> to vector<8x16xf32>
    %185 = math.tanh %184 : vector<8x16xf32>
    %186 = vector.extract_strided_slice %169 {offsets = [0, 48], sizes = [8, 16], strides = [1, 1]} : vector<8x64xf32> to vector<8x16xf32>
    %cst_94 = arith.constant 0.000000e+00 : f32
    %187 = vector.broadcast %cst_94 : f32 to vector<8x16xf32>
    %188 = arith.subf %187, %186 : vector<8x16xf32>
    %189 = math.exp %188 : vector<8x16xf32>
    %cst_95 = arith.constant 1.000000e+00 : f32
    %190 = vector.broadcast %cst_95 : f32 to vector<8x16xf32>
    %191 = arith.addf %190, %189 : vector<8x16xf32>
    %192 = tpu.reciprocal %191 : vector<8x16xf32> -> vector<8x16xf32>
    %c0_96 = arith.constant 0 : index
    %c0_97 = arith.constant 0 : index
    %193 = vector.load %arg9[%c0_96, %c0_97] : memref<8x16xf32, #tpu.memory_space<vmem>>, vector<8x16xf32>
    %194 = arith.mulf %183, %193 : vector<8x16xf32>
    %195 = arith.mulf %176, %185 : vector<8x16xf32>
    %196 = arith.addf %194, %195 : vector<8x16xf32>
    %197 = math.tanh %196 : vector<8x16xf32>
    %198 = arith.mulf %192, %197 : vector<8x16xf32>
    %199 = arith.truncf %198 : vector<8x16xf32> to vector<8x16xbf16>
    %c0_98 = arith.constant 0 : index
    %c0_99 = arith.constant 0 : index
    %200 = vector.load %arg9[%c0_98, %c0_99] : memref<8x16xf32, #tpu.memory_space<vmem>>, vector<8x16xf32>
    tpu.vector_store %arg9[%c0_98, %c0_99], %196 {strides = array<i32>} : memref<8x16xf32, #tpu.memory_space<vmem>>, vector<8x16xf32>,
    %c0_100 = arith.constant 0 : index
    %c0_101 = arith.constant 0 : index
    %201 = vector.load %arg8[%c0_100, %c0_101] : memref<8x16xbf16, #tpu.memory_space<vmem>>, vector<8x16xbf16>
    tpu.vector_store %arg8[%c0_100, %c0_101], %199 {strides = array<i32>} : memref<8x16xbf16, #tpu.memory_space<vmem>>, vector<8x16xbf16>,
    %c0_102 = arith.constant 0 : index
    %202 = arith.index_cast %162 : i32 to index
    %c0_103 = arith.constant 0 : index
    %c0_104 = arith.constant 0 : index
    %203 = vector.load %arg6[%c0_102, %202, %c0_103, %c0_104] : memref<1x8x8x16xbf16, #tpu.memory_space<vmem>>, vector<1x1x8x16xbf16>
    %204 = vector.shape_cast %203 : vector<1x1x8x16xbf16> to vector<8x16xbf16>
    %205 = vector.shape_cast %199 : vector<8x16xbf16> to vector<1x1x8x16xbf16>
    tpu.vector_store %arg6[%c0_102, %202, %c0_103, %c0_104], %205 {strides = array<i32>} : memref<1x8x8x16xbf16, #tpu.memory_space<vmem>>, vector<1x1x8x16xbf16>,
    %c4_i32 = arith.constant 4 : i32
    %c2_i32_105 = arith.constant 2 : i32
    %206 = arith.muli %c2_i32_105, %c4_i32 : i32
    %c7_i32_106 = arith.constant 7 : i32
    %207 = arith.subi %c7_i32_106, %206 : i32
    %208 = arith.muli %arg0, %207 : i32
    %209 = arith.addi %c4_i32, %208 : i32
    %210 = arith.index_cast %209 : i32 to index
    %c0_107 = arith.constant 0 : index
    %c0_108 = arith.constant 0 : index
    %211 = vector.load %arg7[%210, %c0_107, %c0_108] : memref<8x8x64xbf16, #tpu.memory_space<vmem>>, vector<1x8x64xbf16>
    %212 = vector.shape_cast %211 : vector<1x8x64xbf16> to vector<8x64xbf16>
    %213 = arith.extf %212 : vector<8x64xbf16> to vector<8x64xf32>
    %c0_109 = arith.constant 0 : index
    %c0_110 = arith.constant 0 : index
    %214 = vector.load %arg8[%c0_109, %c0_110] : memref<8x16xbf16, #tpu.memory_space<vmem>>, vector<8x16xbf16>
    %cst_111 = arith.constant dense<0.000000e+00> : vector<8x64xf32>
    %215 = tpu.matmul %214, %17, %cst_111 {dimension_numbers = #tpu.dot_dimension_numbers<[1], [0], [0], [1], [0, 0, 1, 1], [], []>} : vector<8x16xbf16>, vector<16x64xbf16>, vector<8x64xf32> -> vector<8x64xf32>
    %216 = arith.addf %213, %215 : vector<8x64xf32>
    %217 = vector.extract_strided_slice %216 {offsets = [0, 0], sizes = [8, 16], strides = [1, 1]} : vector<8x64xf32> to vector<8x16xf32>
    %cst_112 = arith.constant 0.000000e+00 : f32
    %218 = vector.broadcast %cst_112 : f32 to vector<8x16xf32>
    %219 = arith.subf %218, %217 : vector<8x16xf32>
    %220 = math.exp %219 : vector<8x16xf32>
    %cst_113 = arith.constant 1.000000e+00 : f32
    %221 = vector.broadcast %cst_113 : f32 to vector<8x16xf32>
    %222 = arith.addf %221, %220 : vector<8x16xf32>
    %223 = tpu.reciprocal %222 : vector<8x16xf32> -> vector<8x16xf32>
    %224 = vector.extract_strided_slice %216 {offsets = [0, 16], sizes = [8, 16], strides = [1, 1]} : vector<8x64xf32> to vector<8x16xf32>
    %cst_114 = arith.constant 0.000000e+00 : f32
    %225 = vector.broadcast %cst_114 : f32 to vector<8x16xf32>
    %226 = arith.subf %225, %224 : vector<8x16xf32>
    %227 = math.exp %226 : vector<8x16xf32>
    %cst_115 = arith.constant 1.000000e+00 : f32
    %228 = vector.broadcast %cst_115 : f32 to vector<8x16xf32>
    %229 = arith.addf %228, %227 : vector<8x16xf32>
    %230 = tpu.reciprocal %229 : vector<8x16xf32> -> vector<8x16xf32>
    %231 = vector.extract_strided_slice %216 {offsets = [0, 32], sizes = [8, 16], strides = [1, 1]} : vector<8x64xf32> to vector<8x16xf32>
    %232 = math.tanh %231 : vector<8x16xf32>
    %233 = vector.extract_strided_slice %216 {offsets = [0, 48], sizes = [8, 16], strides = [1, 1]} : vector<8x64xf32> to vector<8x16xf32>
    %cst_116 = arith.constant 0.000000e+00 : f32
    %234 = vector.broadcast %cst_116 : f32 to vector<8x16xf32>
    %235 = arith.subf %234, %233 : vector<8x16xf32>
    %236 = math.exp %235 : vector<8x16xf32>
    %cst_117 = arith.constant 1.000000e+00 : f32
    %237 = vector.broadcast %cst_117 : f32 to vector<8x16xf32>
    %238 = arith.addf %237, %236 : vector<8x16xf32>
    %239 = tpu.reciprocal %238 : vector<8x16xf32> -> vector<8x16xf32>
    %c0_118 = arith.constant 0 : index
    %c0_119 = arith.constant 0 : index
    %240 = vector.load %arg9[%c0_118, %c0_119] : memref<8x16xf32, #tpu.memory_space<vmem>>, vector<8x16xf32>
    %241 = arith.mulf %230, %240 : vector<8x16xf32>
    %242 = arith.mulf %223, %232 : vector<8x16xf32>
    %243 = arith.addf %241, %242 : vector<8x16xf32>
    %244 = math.tanh %243 : vector<8x16xf32>
    %245 = arith.mulf %239, %244 : vector<8x16xf32>
    %246 = arith.truncf %245 : vector<8x16xf32> to vector<8x16xbf16>
    %c0_120 = arith.constant 0 : index
    %c0_121 = arith.constant 0 : index
    %247 = vector.load %arg9[%c0_120, %c0_121] : memref<8x16xf32, #tpu.memory_space<vmem>>, vector<8x16xf32>
    tpu.vector_store %arg9[%c0_120, %c0_121], %243 {strides = array<i32>} : memref<8x16xf32, #tpu.memory_space<vmem>>, vector<8x16xf32>,
    %c0_122 = arith.constant 0 : index
    %c0_123 = arith.constant 0 : index
    %248 = vector.load %arg8[%c0_122, %c0_123] : memref<8x16xbf16, #tpu.memory_space<vmem>>, vector<8x16xbf16>
    tpu.vector_store %arg8[%c0_122, %c0_123], %246 {strides = array<i32>} : memref<8x16xbf16, #tpu.memory_space<vmem>>, vector<8x16xbf16>,
    %c0_124 = arith.constant 0 : index
    %249 = arith.index_cast %209 : i32 to index
    %c0_125 = arith.constant 0 : index
    %c0_126 = arith.constant 0 : index
    %250 = vector.load %arg6[%c0_124, %249, %c0_125, %c0_126] : memref<1x8x8x16xbf16, #tpu.memory_space<vmem>>, vector<1x1x8x16xbf16>
    %251 = vector.shape_cast %250 : vector<1x1x8x16xbf16> to vector<8x16xbf16>
    %252 = vector.shape_cast %246 : vector<8x16xbf16> to vector<1x1x8x16xbf16>
    tpu.vector_store %arg6[%c0_124, %249, %c0_125, %c0_126], %252 {strides = array<i32>} : memref<1x8x8x16xbf16, #tpu.memory_space<vmem>>, vector<1x1x8x16xbf16>,
    %c5_i32 = arith.constant 5 : i32
    %c2_i32_127 = arith.constant 2 : i32
    %253 = arith.muli %c2_i32_127, %c5_i32 : i32
    %c7_i32_128 = arith.constant 7 : i32
    %254 = arith.subi %c7_i32_128, %253 : i32
    %255 = arith.muli %arg0, %254 : i32
    %256 = arith.addi %c5_i32, %255 : i32
    %257 = arith.index_cast %256 : i32 to index
    %c0_129 = arith.constant 0 : index
    %c0_130 = arith.constant 0 : index
    %258 = vector.load %arg7[%257, %c0_129, %c0_130] : memref<8x8x64xbf16, #tpu.memory_space<vmem>>, vector<1x8x64xbf16>
    %259 = vector.shape_cast %258 : vector<1x8x64xbf16> to vector<8x64xbf16>
    %260 = arith.extf %259 : vector<8x64xbf16> to vector<8x64xf32>
    %c0_131 = arith.constant 0 : index
    %c0_132 = arith.constant 0 : index
    %261 = vector.load %arg8[%c0_131, %c0_132] : memref<8x16xbf16, #tpu.memory_space<vmem>>, vector<8x16xbf16>
    %cst_133 = arith.constant dense<0.000000e+00> : vector<8x64xf32>
    %262 = tpu.matmul %261, %17, %cst_133 {dimension_numbers = #tpu.dot_dimension_numbers<[1], [0], [0], [1], [0, 0, 1, 1], [], []>} : vector<8x16xbf16>, vector<16x64xbf16>, vector<8x64xf32> -> vector<8x64xf32>
    %263 = arith.addf %260, %262 : vector<8x64xf32>
    %264 = vector.extract_strided_slice %263 {offsets = [0, 0], sizes = [8, 16], strides = [1, 1]} : vector<8x64xf32> to vector<8x16xf32>
    %cst_134 = arith.constant 0.000000e+00 : f32
    %265 = vector.broadcast %cst_134 : f32 to vector<8x16xf32>
    %266 = arith.subf %265, %264 : vector<8x16xf32>
    %267 = math.exp %266 : vector<8x16xf32>
    %cst_135 = arith.constant 1.000000e+00 : f32
    %268 = vector.broadcast %cst_135 : f32 to vector<8x16xf32>
    %269 = arith.addf %268, %267 : vector<8x16xf32>
    %270 = tpu.reciprocal %269 : vector<8x16xf32> -> vector<8x16xf32>
    %271 = vector.extract_strided_slice %263 {offsets = [0, 16], sizes = [8, 16], strides = [1, 1]} : vector<8x64xf32> to vector<8x16xf32>
    %cst_136 = arith.constant 0.000000e+00 : f32
    %272 = vector.broadcast %cst_136 : f32 to vector<8x16xf32>
    %273 = arith.subf %272, %271 : vector<8x16xf32>
    %274 = math.exp %273 : vector<8x16xf32>
    %cst_137 = arith.constant 1.000000e+00 : f32
    %275 = vector.broadcast %cst_137 : f32 to vector<8x16xf32>
    %276 = arith.addf %275, %274 : vector<8x16xf32>
    %277 = tpu.reciprocal %276 : vector<8x16xf32> -> vector<8x16xf32>
    %278 = vector.extract_strided_slice %263 {offsets = [0, 32], sizes = [8, 16], strides = [1, 1]} : vector<8x64xf32> to vector<8x16xf32>
    %279 = math.tanh %278 : vector<8x16xf32>
    %280 = vector.extract_strided_slice %263 {offsets = [0, 48], sizes = [8, 16], strides = [1, 1]} : vector<8x64xf32> to vector<8x16xf32>
    %cst_138 = arith.constant 0.000000e+00 : f32
    %281 = vector.broadcast %cst_138 : f32 to vector<8x16xf32>
    %282 = arith.subf %281, %280 : vector<8x16xf32>
    %283 = math.exp %282 : vector<8x16xf32>
    %cst_139 = arith.constant 1.000000e+00 : f32
    %284 = vector.broadcast %cst_139 : f32 to vector<8x16xf32>
    %285 = arith.addf %284, %283 : vector<8x16xf32>
    %286 = tpu.reciprocal %285 : vector<8x16xf32> -> vector<8x16xf32>
    %c0_140 = arith.constant 0 : index
    %c0_141 = arith.constant 0 : index
    %287 = vector.load %arg9[%c0_140, %c0_141] : memref<8x16xf32, #tpu.memory_space<vmem>>, vector<8x16xf32>
    %288 = arith.mulf %277, %287 : vector<8x16xf32>
    %289 = arith.mulf %270, %279 : vector<8x16xf32>
    %290 = arith.addf %288, %289 : vector<8x16xf32>
    %291 = math.tanh %290 : vector<8x16xf32>
    %292 = arith.mulf %286, %291 : vector<8x16xf32>
    %293 = arith.truncf %292 : vector<8x16xf32> to vector<8x16xbf16>
    %c0_142 = arith.constant 0 : index
    %c0_143 = arith.constant 0 : index
    %294 = vector.load %arg9[%c0_142, %c0_143] : memref<8x16xf32, #tpu.memory_space<vmem>>, vector<8x16xf32>
    tpu.vector_store %arg9[%c0_142, %c0_143], %290 {strides = array<i32>} : memref<8x16xf32, #tpu.memory_space<vmem>>, vector<8x16xf32>,
    %c0_144 = arith.constant 0 : index
    %c0_145 = arith.constant 0 : index
    %295 = vector.load %arg8[%c0_144, %c0_145] : memref<8x16xbf16, #tpu.memory_space<vmem>>, vector<8x16xbf16>
    tpu.vector_store %arg8[%c0_144, %c0_145], %293 {strides = array<i32>} : memref<8x16xbf16, #tpu.memory_space<vmem>>, vector<8x16xbf16>,
    %c0_146 = arith.constant 0 : index
    %296 = arith.index_cast %256 : i32 to index
    %c0_147 = arith.constant 0 : index
    %c0_148 = arith.constant 0 : index
    %297 = vector.load %arg6[%c0_146, %296, %c0_147, %c0_148] : memref<1x8x8x16xbf16, #tpu.memory_space<vmem>>, vector<1x1x8x16xbf16>
    %298 = vector.shape_cast %297 : vector<1x1x8x16xbf16> to vector<8x16xbf16>
    %299 = vector.shape_cast %293 : vector<8x16xbf16> to vector<1x1x8x16xbf16>
    tpu.vector_store %arg6[%c0_146, %296, %c0_147, %c0_148], %299 {strides = array<i32>} : memref<1x8x8x16xbf16, #tpu.memory_space<vmem>>, vector<1x1x8x16xbf16>,
    %c6_i32 = arith.constant 6 : i32
    %c2_i32_149 = arith.constant 2 : i32
    %300 = arith.muli %c2_i32_149, %c6_i32 : i32
    %c7_i32_150 = arith.constant 7 : i32
    %301 = arith.subi %c7_i32_150, %300 : i32
    %302 = arith.muli %arg0, %301 : i32
    %303 = arith.addi %c6_i32, %302 : i32
    %304 = arith.index_cast %303 : i32 to index
    %c0_151 = arith.constant 0 : index
    %c0_152 = arith.constant 0 : index
    %305 = vector.load %arg7[%304, %c0_151, %c0_152] : memref<8x8x64xbf16, #tpu.memory_space<vmem>>, vector<1x8x64xbf16>
    %306 = vector.shape_cast %305 : vector<1x8x64xbf16> to vector<8x64xbf16>
    %307 = arith.extf %306 : vector<8x64xbf16> to vector<8x64xf32>
    %c0_153 = arith.constant 0 : index
    %c0_154 = arith.constant 0 : index
    %308 = vector.load %arg8[%c0_153, %c0_154] : memref<8x16xbf16, #tpu.memory_space<vmem>>, vector<8x16xbf16>
    %cst_155 = arith.constant dense<0.000000e+00> : vector<8x64xf32>
    %309 = tpu.matmul %308, %17, %cst_155 {dimension_numbers = #tpu.dot_dimension_numbers<[1], [0], [0], [1], [0, 0, 1, 1], [], []>} : vector<8x16xbf16>, vector<16x64xbf16>, vector<8x64xf32> -> vector<8x64xf32>
    %310 = arith.addf %307, %309 : vector<8x64xf32>
    %311 = vector.extract_strided_slice %310 {offsets = [0, 0], sizes = [8, 16], strides = [1, 1]} : vector<8x64xf32> to vector<8x16xf32>
    %cst_156 = arith.constant 0.000000e+00 : f32
    %312 = vector.broadcast %cst_156 : f32 to vector<8x16xf32>
    %313 = arith.subf %312, %311 : vector<8x16xf32>
    %314 = math.exp %313 : vector<8x16xf32>
    %cst_157 = arith.constant 1.000000e+00 : f32
    %315 = vector.broadcast %cst_157 : f32 to vector<8x16xf32>
    %316 = arith.addf %315, %314 : vector<8x16xf32>
    %317 = tpu.reciprocal %316 : vector<8x16xf32> -> vector<8x16xf32>
    %318 = vector.extract_strided_slice %310 {offsets = [0, 16], sizes = [8, 16], strides = [1, 1]} : vector<8x64xf32> to vector<8x16xf32>
    %cst_158 = arith.constant 0.000000e+00 : f32
    %319 = vector.broadcast %cst_158 : f32 to vector<8x16xf32>
    %320 = arith.subf %319, %318 : vector<8x16xf32>
    %321 = math.exp %320 : vector<8x16xf32>
    %cst_159 = arith.constant 1.000000e+00 : f32
    %322 = vector.broadcast %cst_159 : f32 to vector<8x16xf32>
    %323 = arith.addf %322, %321 : vector<8x16xf32>
    %324 = tpu.reciprocal %323 : vector<8x16xf32> -> vector<8x16xf32>
    %325 = vector.extract_strided_slice %310 {offsets = [0, 32], sizes = [8, 16], strides = [1, 1]} : vector<8x64xf32> to vector<8x16xf32>
    %326 = math.tanh %325 : vector<8x16xf32>
    %327 = vector.extract_strided_slice %310 {offsets = [0, 48], sizes = [8, 16], strides = [1, 1]} : vector<8x64xf32> to vector<8x16xf32>
    %cst_160 = arith.constant 0.000000e+00 : f32
    %328 = vector.broadcast %cst_160 : f32 to vector<8x16xf32>
    %329 = arith.subf %328, %327 : vector<8x16xf32>
    %330 = math.exp %329 : vector<8x16xf32>
    %cst_161 = arith.constant 1.000000e+00 : f32
    %331 = vector.broadcast %cst_161 : f32 to vector<8x16xf32>
    %332 = arith.addf %331, %330 : vector<8x16xf32>
    %333 = tpu.reciprocal %332 : vector<8x16xf32> -> vector<8x16xf32>
    %c0_162 = arith.constant 0 : index
    %c0_163 = arith.constant 0 : index
    %334 = vector.load %arg9[%c0_162, %c0_163] : memref<8x16xf32, #tpu.memory_space<vmem>>, vector<8x16xf32>
    %335 = arith.mulf %324, %334 : vector<8x16xf32>
    %336 = arith.mulf %317, %326 : vector<8x16xf32>
    %337 = arith.addf %335, %336 : vector<8x16xf32>
    %338 = math.tanh %337 : vector<8x16xf32>
    %339 = arith.mulf %333, %338 : vector<8x16xf32>
    %340 = arith.truncf %339 : vector<8x16xf32> to vector<8x16xbf16>
    %c0_164 = arith.constant 0 : index
    %c0_165 = arith.constant 0 : index
    %341 = vector.load %arg9[%c0_164, %c0_165] : memref<8x16xf32, #tpu.memory_space<vmem>>, vector<8x16xf32>
    tpu.vector_store %arg9[%c0_164, %c0_165], %337 {strides = array<i32>} : memref<8x16xf32, #tpu.memory_space<vmem>>, vector<8x16xf32>,
    %c0_166 = arith.constant 0 : index
    %c0_167 = arith.constant 0 : index
    %342 = vector.load %arg8[%c0_166, %c0_167] : memref<8x16xbf16, #tpu.memory_space<vmem>>, vector<8x16xbf16>
    tpu.vector_store %arg8[%c0_166, %c0_167], %340 {strides = array<i32>} : memref<8x16xbf16, #tpu.memory_space<vmem>>, vector<8x16xbf16>,
    %c0_168 = arith.constant 0 : index
    %343 = arith.index_cast %303 : i32 to index
    %c0_169 = arith.constant 0 : index
    %c0_170 = arith.constant 0 : index
    %344 = vector.load %arg6[%c0_168, %343, %c0_169, %c0_170] : memref<1x8x8x16xbf16, #tpu.memory_space<vmem>>, vector<1x1x8x16xbf16>
    %345 = vector.shape_cast %344 : vector<1x1x8x16xbf16> to vector<8x16xbf16>
    %346 = vector.shape_cast %340 : vector<8x16xbf16> to vector<1x1x8x16xbf16>
    tpu.vector_store %arg6[%c0_168, %343, %c0_169, %c0_170], %346 {strides = array<i32>} : memref<1x8x8x16xbf16, #tpu.memory_space<vmem>>, vector<1x1x8x16xbf16>,
    %c7_i32_171 = arith.constant 7 : i32
    %c2_i32_172 = arith.constant 2 : i32
    %347 = arith.muli %c2_i32_172, %c7_i32_171 : i32
    %c7_i32_173 = arith.constant 7 : i32
    %348 = arith.subi %c7_i32_173, %347 : i32
    %349 = arith.muli %arg0, %348 : i32
    %350 = arith.addi %c7_i32_171, %349 : i32
    %351 = arith.index_cast %350 : i32 to index
    %c0_174 = arith.constant 0 : index
    %c0_175 = arith.constant 0 : index
    %352 = vector.load %arg7[%351, %c0_174, %c0_175] : memref<8x8x64xbf16, #tpu.memory_space<vmem>>, vector<1x8x64xbf16>
    %353 = vector.shape_cast %352 : vector<1x8x64xbf16> to vector<8x64xbf16>
    %354 = arith.extf %353 : vector<8x64xbf16> to vector<8x64xf32>
    %c0_176 = arith.constant 0 : index
    %c0_177 = arith.constant 0 : index
    %355 = vector.load %arg8[%c0_176, %c0_177] : memref<8x16xbf16, #tpu.memory_space<vmem>>, vector<8x16xbf16>
    %cst_178 = arith.constant dense<0.000000e+00> : vector<8x64xf32>
    %356 = tpu.matmul %355, %17, %cst_178 {dimension_numbers = #tpu.dot_dimension_numbers<[1], [0], [0], [1], [0, 0, 1, 1], [], []>} : vector<8x16xbf16>, vector<16x64xbf16>, vector<8x64xf32> -> vector<8x64xf32>
    %357 = arith.addf %354, %356 : vector<8x64xf32>
    %358 = vector.extract_strided_slice %357 {offsets = [0, 0], sizes = [8, 16], strides = [1, 1]} : vector<8x64xf32> to vector<8x16xf32>
    %cst_179 = arith.constant 0.000000e+00 : f32
    %359 = vector.broadcast %cst_179 : f32 to vector<8x16xf32>
    %360 = arith.subf %359, %358 : vector<8x16xf32>
    %361 = math.exp %360 : vector<8x16xf32>
    %cst_180 = arith.constant 1.000000e+00 : f32
    %362 = vector.broadcast %cst_180 : f32 to vector<8x16xf32>
    %363 = arith.addf %362, %361 : vector<8x16xf32>
    %364 = tpu.reciprocal %363 : vector<8x16xf32> -> vector<8x16xf32>
    %365 = vector.extract_strided_slice %357 {offsets = [0, 16], sizes = [8, 16], strides = [1, 1]} : vector<8x64xf32> to vector<8x16xf32>
    %cst_181 = arith.constant 0.000000e+00 : f32
    %366 = vector.broadcast %cst_181 : f32 to vector<8x16xf32>
    %367 = arith.subf %366, %365 : vector<8x16xf32>
    %368 = math.exp %367 : vector<8x16xf32>
    %cst_182 = arith.constant 1.000000e+00 : f32
    %369 = vector.broadcast %cst_182 : f32 to vector<8x16xf32>
    %370 = arith.addf %369, %368 : vector<8x16xf32>
    %371 = tpu.reciprocal %370 : vector<8x16xf32> -> vector<8x16xf32>
    %372 = vector.extract_strided_slice %357 {offsets = [0, 32], sizes = [8, 16], strides = [1, 1]} : vector<8x64xf32> to vector<8x16xf32>
    %373 = math.tanh %372 : vector<8x16xf32>
    %374 = vector.extract_strided_slice %357 {offsets = [0, 48], sizes = [8, 16], strides = [1, 1]} : vector<8x64xf32> to vector<8x16xf32>
    %cst_183 = arith.constant 0.000000e+00 : f32
    %375 = vector.broadcast %cst_183 : f32 to vector<8x16xf32>
    %376 = arith.subf %375, %374 : vector<8x16xf32>
    %377 = math.exp %376 : vector<8x16xf32>
    %cst_184 = arith.constant 1.000000e+00 : f32
    %378 = vector.broadcast %cst_184 : f32 to vector<8x16xf32>
    %379 = arith.addf %378, %377 : vector<8x16xf32>
    %380 = tpu.reciprocal %379 : vector<8x16xf32> -> vector<8x16xf32>
    %c0_185 = arith.constant 0 : index
    %c0_186 = arith.constant 0 : index
    %381 = vector.load %arg9[%c0_185, %c0_186] : memref<8x16xf32, #tpu.memory_space<vmem>>, vector<8x16xf32>
    %382 = arith.mulf %371, %381 : vector<8x16xf32>
    %383 = arith.mulf %364, %373 : vector<8x16xf32>
    %384 = arith.addf %382, %383 : vector<8x16xf32>
    %385 = math.tanh %384 : vector<8x16xf32>
    %386 = arith.mulf %380, %385 : vector<8x16xf32>
    %387 = arith.truncf %386 : vector<8x16xf32> to vector<8x16xbf16>
    %c0_187 = arith.constant 0 : index
    %c0_188 = arith.constant 0 : index
    %388 = vector.load %arg9[%c0_187, %c0_188] : memref<8x16xf32, #tpu.memory_space<vmem>>, vector<8x16xf32>
    tpu.vector_store %arg9[%c0_187, %c0_188], %384 {strides = array<i32>} : memref<8x16xf32, #tpu.memory_space<vmem>>, vector<8x16xf32>,
    %c0_189 = arith.constant 0 : index
    %c0_190 = arith.constant 0 : index
    %389 = vector.load %arg8[%c0_189, %c0_190] : memref<8x16xbf16, #tpu.memory_space<vmem>>, vector<8x16xbf16>
    tpu.vector_store %arg8[%c0_189, %c0_190], %387 {strides = array<i32>} : memref<8x16xbf16, #tpu.memory_space<vmem>>, vector<8x16xbf16>,
    %c0_191 = arith.constant 0 : index
    %390 = arith.index_cast %350 : i32 to index
    %c0_192 = arith.constant 0 : index
    %c0_193 = arith.constant 0 : index
    %391 = vector.load %arg6[%c0_191, %390, %c0_192, %c0_193] : memref<1x8x8x16xbf16, #tpu.memory_space<vmem>>, vector<1x1x8x16xbf16>
    %392 = vector.shape_cast %391 : vector<1x1x8x16xbf16> to vector<8x16xbf16>
    %393 = vector.shape_cast %387 : vector<8x16xbf16> to vector<1x1x8x16xbf16>
    tpu.vector_store %arg6[%c0_191, %390, %c0_192, %c0_193], %393 {strides = array<i32>} : memref<1x8x8x16xbf16, #tpu.memory_space<vmem>>, vector<1x1x8x16xbf16>,
    %c8_i32 = arith.constant 8 : i32
    return
  }
  func.func @transform_0(%arg0: i32, %arg1: i32) -> (i32, i32, i32, i32) {
    %c2_i32 = arith.constant 2 : i32
    %0 = arith.muli %c2_i32, %arg1 : i32
    %c0_i32 = arith.constant 0 : i32
    %1 = arith.subi %c0_i32, %0 : i32
    %2 = arith.muli %arg0, %1 : i32
    %3 = arith.addi %arg1, %2 : i32
    %c0_i32_0 = arith.constant 0 : i32
    %c0_i32_1 = arith.constant 0 : i32
    %c0_i32_2 = arith.constant 0 : i32
    %c0_i32_3 = arith.constant 0 : i32
    return %c0_i32_0, %3, %c0_i32_1, %c0_i32_2 : i32, i32, i32, i32
  }
  func.func @transform_1(%arg0: i32, %arg1: i32) -> (i32, i32, i32, i32) {
    %c0_i32 = arith.constant 0 : i32
    %c0_i32_0 = arith.constant 0 : i32
    %c0_i32_1 = arith.constant 0 : i32
    %c0_i32_2 = arith.constant 0 : i32
    return %arg0, %c0_i32, %c0_i32_0, %c0_i32_1 : i32, i32, i32, i32
  }
  func.func @transform_2(%arg0: i32, %arg1: i32) -> (i32, i32, i32) {
    %c0_i32 = arith.constant 0 : i32
    %c0_i32_0 = arith.constant 0 : i32
    %c0_i32_1 = arith.constant 0 : i32
    return %arg0, %c0_i32, %c0_i32_0 : i32, i32, i32
  }
  func.func @transform_3(%arg0: i32, %arg1: i32) -> (i32, i32, i32) {
    %c0_i32 = arith.constant 0 : i32
    %c0_i32_0 = arith.constant 0 : i32
    %c0_i32_1 = arith.constant 0 : i32
    return %arg0, %c0_i32, %c0_i32_0 : i32, i32, i32
  }
  func.func @transform_4(%arg0: i32, %arg1: i32) -> (i32, i32, i32, i32) {
    %c2_i32 = arith.constant 2 : i32
    %0 = arith.muli %c2_i32, %arg1 : i32
    %c0_i32 = arith.constant 0 : i32
    %1 = arith.subi %c0_i32, %0 : i32
    %2 = arith.muli %arg0, %1 : i32
    %3 = arith.addi %arg1, %2 : i32
    %c0_i32_0 = arith.constant 0 : i32
    %c0_i32_1 = arith.constant 0 : i32
    %c0_i32_2 = arith.constant 0 : i32
    return %arg0, %3, %c0_i32_0, %c0_i32_1 : i32, i32, i32, i32
  }
}

</mosaic_0001>

<bundles_post_ra>
// kernel: tpu_custom_call.1
= control target key start
LH: loop header
LB: loop body
LE: loop exit
PB: predicated region body
PF: predicated region fallthrough
CT: control target
= control target key end

     0   :  { %s2488_s0 = inlined_call_operand.hbm [shape: bf16[1,8,8,32], index: 0, kind: input, shape index: {}]   ;;  %s2489_s1 = inlined_call_operand.hbm [shape: bf16[2,1,32,64], index: 1, kind: input, shape index: {}]   ;;  %s2490_s2 = inlined_call_operand.hbm [shape: bf16[2,16,64], index: 2, kind: input, shape index: {}]   ;;  %s2491_s3 = inlined_call_operand.vmem [shape: f32[2,1,64], index: 3, kind: input, shape index: {}]   ;;  %s2492_s4 = inlined_call_operand.hbm [shape: bf16[2,8,8,16], index: 4, kind: output, shape index: {}]  }
   0x1   :  { %2506 = sst [smem:[#allocation17_spill]] %s2489_s1 }
   0x2   :  { %9 = vsyncpa [#allocation6], 0 }
   0x3   :  { %11 = vsyncpa [#allocation6 + $0x1], 0 }
   0x4   :  { %12 = vsyncpa [#allocation9], 0 }
   0x5   :  { %14 = vsyncpa [#allocation9 + $0x1], 0 }
   0x6   :  { %15 = vsyncpa [#allocation7], 0 }
   0x7   :  { %17 = vsyncpa [#allocation7 + $0x1], 0  ;;  %s2034_s15 = smov 0   ;;  %s2036_s16 = smov 0  }
   0x8   :  { %s2038_s17 = smov 0   ;;  %s2040_s18 = smov 0  }
   0x9   :  { %s2042_s19 = smov 0   ;;  %s2044_s20 = smov 0  }
   0xa LB: > { %s2065_s21 = sadd.s32 4294967295, %s1991_s20   ;;  %s1486_s22 = sadd.s32 4294967294, %s1991_s20   ;;  %s1991_s20 = sphi %s2044_s20, %s23_s20   ;;  %s1987_s19 = sphi %s2042_s19, %s2538_s19   ;;  %s1983_s18 = sphi %s2040_s18, %s2537_s18   ;;  %s1979_s17 = sphi %s2038_s17, %s2536_s17   ;;  %s1975_s16 = sphi %s2036_s16, %s2535_s16   ;;  %s1971_s15 = sphi %s2034_s15, %s2534_s15  }
   0xb   : > { %s35_s23 = sadd.s32 1, %s1987_s19  ;;  %s76_s24 = sadd.s32 1, %s1979_s17 }
   0xc   : > { %p37_p0 = scmp.ge.s32.totalorder %s35_s23, 2  ;;  %p83_p1 = scmp.ne.s32.totalorder %s1979_s17, %s1975_s16 }
   0xd   : > { %p2495_p2 = scmp.eq.s32.totalorder %s1991_s20, 0  ;;  %p89_p3 = scmp.ne.s32.totalorder %s1975_s16, %s1971_s15 }
   0xe   : > { %s2540_s23 = smov (%p37_p0, %s35_s23), 0  ;;  %p2493_p5 = scmp.eq.s32.totalorder %s2065_s21, 0 }
   0xf   : > { %2507 = sst [smem:[#allocation15_spill]] %s2540_s23  ;;  %p2079_p4 = por %p2495_p2, %p83_p1 }
  0x10   : > { %s73_s26 = ssub.s32 %s1987_s19, %s2540_s23  ;;  %p175_p6 = scmp.eq.s32.totalorder %s2065_s21, 1 }
  0x11   : > { %p74_p7 = scmp.eq.s32.totalorder %s73_s26, 0  ;;  %p2089_p8 = por %p2493_p5, %p89_p3 }
  0x12   : > { %p2093_p9 = por %p175_p6, %p83_p1  ;;  %p181_p10 = scmp.eq.s32.totalorder %s1486_s22, 1 }
  0x13   : > { %s2509_s27 = scalar_select %p2089_p8, 1, 0 }
  0x14   : > { %s2510_s28 = scalar_select %p2093_p9, 1, 0 }
  0x15   : > { %s2098_s29 = scalar_select %p74_p7, %s1979_s17, %s76_s24  }
  0x16   : > { %p2100_p11 = por %p181_p10, %p89_p3  ;;  %p2494_p13 = scmp.lt.s32.totalorder %s1991_s20, 2 }
  0x17   : > { %2511 = sst [smem:[#allocation16_spill]] %s2098_s29  ;;  %s226_s5 = sand.u32 1, %s1991_s20  }
  0x18   : > { %s2512_s30 = scalar_select %p2100_p11, 1, 0 }
  0x19   : > { %s228_s6 = sand.u32 1, %s1979_s17   ;;  %s1562_s8 = sshll.u32 %s1987_s19, 8 }
  0x1a   : > { %s1490_s7 = sshll.u32 %s228_s6, 4  ;;  %s2513_s1 = sld [smem:[#allocation17_spill]] }
  0x1b   : > { %s230_s12 = scalar_lea.vmem [#allocation8], %s1490_s7  ;;  %p2120_p0 = pnand %p2494_p13, %p2079_p4 }
  0x1c   : > { %s237_s13 = sshll.u32 %s230_s12, 4  ;;  %s2124_s22 = sshll.u32 %s228_s6, 3  ;;  %s2114_s13 = int_to_ptr.vmem [resolvable:$true] %s237_s13 }
  0x1d   : > { %s2514_s14 = scalar_select %p2120_p0, 1, 0 }
  0x1e   : > { %s2127_s24 = scalar_lea.sflag [#allocation9], %s226_s5  ;;  %p2502_p6 = pneg %p2120_p0 }
  0x20   : > { %s2112_s11 = scalar_lea.hbm %s2513_s1, %s1562_s8  ;;  %s1822_s8 = scalar_lea.hbm %s2513_s1, 512 }
  0x21   : > { %s1817_s26 = scalar_lea.hbm %s2112_s11, 256  ;;  %p1823_p4 = scmp.lt.u32.totalorder %s2112_s11, %s2513_s1 }
  0x22   : > { %p1818_p3 = scmp.ne.s32.totalorder %s2112_s11, %s1817_s26  ;;  %p1824_p12 = scmp.lt.u32.totalorder %s1822_s8, %s1817_s26 }
  0x23   : > { %p1826_p13 = scmp.lt.u32.totalorder %s1817_s26, %s2112_s11 }
  0x24   : > { %p1820_p7 = pnand %p2502_p6, %p1818_p3  ;;  %p1825_p5 = por %p1824_p12, %p1823_p4 }
  0x26   : > { %p1821_p10 = pneg %p1820_p7  ;;  %p1827_p2 = por %p1826_p13, %p1825_p5 }
  0x28   : > { %p1828_p1 = pnand %p1827_p2, %p1821_p10 }
  0x2a   : > { %1831 = shalt.err (!%p1828_p1)
}
  0x2b   : > { %s1832_s5 = scalar_lea.vmem %s2114_s13, 256  ;;  %s1993_s6 = smov [#allocation8]  }
  0x2c   : > { %p1833_p3 = scmp.ne.s32.totalorder %s2114_s13, %s1832_s5  ;;  %s1837_s12 = sshll.u32 %s1993_s6, 4  ;;  %s1838_s12 = int_to_ptr.vmem [resolvable:$false] %s1837_s12 }
  0x2d   : > { %s1839_s25 = scalar_lea.vmem %s1838_s12, 512  ;;  %p1840_p9 = scmp.lt.s32.totalorder %s2114_s13, %s1838_s12 }
  0x2e   : > { %p1835_p7 = pnand %p1833_p3, %p2502_p6  ;;  %p1841_p12 = scmp.lt.s32.totalorder %s1839_s25, %s1832_s5 }
  0x30   : > { %p1836_p11 = pneg %p1835_p7  ;;  %p1842_p4 = por %p1841_p12, %p1840_p9 }
  0x32   : > { %p1843_p5 = pnand %p1842_p4, %p1836_p11 }
  0x34   : > { %1846 = shalt.err (!%p1843_p5)
}
  0x35   : > { %s2497_s26 = smov 64   ;;  %s2499_s7 = smov 4  }
  0x36   : > { %1673 = dma.hbm_to_vmem [thread:$0]  (!%p2120_p0), %s2112_s11, 256, %s2114_s13, %s2127_s24, %s2497_s26, %s2497_s26, %s2499_s7  }
  0x37   : > { %s251_s8 = scalar_lea.vmem [#allocation10], %s2124_s22  ;;  %p272_p2 = scmp.lt.s32.totalorder %s1991_s20, 3 }
  0x38   : > { %s2159_s9 = sshll.u32 %s251_s8, 4  ;;  %p2515_p9 = scmp.ge.s32.totalorder %s1991_s20, 1  ;;  %s2202_s9 = int_to_ptr.vmem [resolvable:$true] %s2159_s9 }
  0x39   : > { %s1996_s5 = smov [#allocation5]   ;;  %p2517_p13 = scmp.eq.s32.totalorder %s1991_s20, 0 }
  0x3a   : > { %p2164_p11 = pnand %p2515_p9, %p272_p2  ;;  %s216_s6 = sshll.u32 %s1996_s5, 4  ;;  %s217_s6 = int_to_ptr.vmem [resolvable:$true] %s216_s6 }
  0x3b   : > { %p2518_p1 = scmp.lt.s32.totalorder %s1991_s20, 2  ;;  %s1563_s11 = sshll.u32 %s1987_s19, 7 }
  0x3c   : > { %s2516_s10 = scalar_select %p2164_p11, 1, 0 }
  0x3d   : > { %p2172_p10 = pnand %p2518_p1, %p2517_p13  ;;  %s2180_s25 = scalar_lea.hbm %s2490_s2, %s1563_s11 }
  0x3e   : > { %s1847_s7 = scalar_lea.hbm %s2488_s0, 512 }
  0x3f   : > { %p1848_p3 = scmp.ne.s32.totalorder %s2488_s0, %s1847_s7  ;;  %p1849_p7 = pneg %p2172_p10 }
  0x40   : > { %p1854_p5 = scmp.lt.u32.totalorder %s1847_s7, %s2488_s0 }
  0x41   : > { %p1850_p12 = pnand %p1849_p7, %p1848_p3 }
  0x43   : > { %p1851_p4 = pneg %p1850_p12 }
  0x45   : > { %p1856_p2 = pnand %p1854_p5, %p1851_p4 }
  0x47   : > { %1859 = shalt.err (!%p1856_p2)
}
  0x48   : > { %s1860_s11 = scalar_lea.vmem %s217_s6, 512  ;;  %s1867_s26 = scalar_lea.vmem %s217_s6, 1024 }
  0x49   : > { %p1861_p9 = scmp.ne.s32.totalorder %s217_s6, %s1860_s11  ;;  %p1868_p6 = scmp.lt.s32.totalorder %s217_s6, %s217_s6 }
  0x4a   : > { %p1869_p8 = scmp.lt.s32.totalorder %s1867_s26, %s1860_s11 }
  0x4b   : > { %p1863_p13 = pnand %p1861_p9, %p1849_p7 }
  0x4c   : > { %p1870_p11 = por %p1869_p8, %p1868_p6 }
  0x4d   : > { %p1864_p1 = pneg %p1863_p13 }
  0x4f   : > { %p1871_p0 = pnand %p1870_p11, %p1864_p1 }
  0x51   : > { %1874 = shalt.err (!%p1871_p0)
}
  0x52   : > { %s2520_s1 = smov 4   ;;  %s2521_s13 = smov 64  }
  0x53   : > { %1670 = dma.hbm_to_vmem [thread:$0]  (!%p2172_p10), %s2488_s0, 512, %s217_s6, [#allocation6], %s2521_s13, %s2521_s13, %s2520_s1  }
  0x54   : > { %s1875_s29 = scalar_lea.hbm %s2180_s25, 128  ;;  %p2522_p0 = scmp.ne.s32.totalorder %s2514_s14, 0 }
  0x55   : > { %p1876_p8 = scmp.ne.s32.totalorder %s2180_s25, %s1875_s29  ;;  %s1880_s8 = scalar_lea.hbm %s2490_s2, 256 }
  0x56   : > { %p2523_p6 = pneg %p2522_p0  ;;  %p1881_p7 = scmp.lt.u32.totalorder %s2180_s25, %s2490_s2 }
  0x57   : > { %p1882_p12 = scmp.lt.u32.totalorder %s1880_s8, %s1875_s29  ;;  %p1884_p5 = scmp.lt.u32.totalorder %s1875_s29, %s2180_s25 }
  0x58   : > { %p1878_p11 = pnand %p1876_p8, %p2523_p6 }
  0x59   : > { %p1883_p4 = por %p1882_p12, %p1881_p7 }
  0x5a   : > { %p1879_p3 = pneg %p1878_p11 }
  0x5b   : > { %p1885_p10 = por %p1884_p5, %p1883_p4 }
  0x5d   : > { %p1886_p2 = pnand %p1885_p10, %p1879_p3 }
  0x5f   : > { %1889 = shalt.err (!%p1886_p2)
}
  0x60   : > { %s1890_s6 = scalar_lea.vmem %s2202_s9, 128  ;;  %p2524_p13 = pmov %p2523_p6 }
  0x61   : > { %p1891_p9 = scmp.ne.s32.totalorder %s2202_s9, %s1890_s6  ;;  %s1997_s26 = smov [#allocation10]  }
  0x62   : > { %s1895_s22 = sshll.u32 %s1997_s26, 4  ;;  %s1896_s22 = int_to_ptr.vmem [resolvable:$false] %s1895_s22 }
  0x63   : > { %p1893_p1 = pnand %p1891_p9, %p2524_p13  ;;  %s1897_s23 = scalar_lea.vmem %s1896_s22, 256 }
  0x64   : > { %p1898_p6 = scmp.lt.s32.totalorder %s2202_s9, %s1896_s22  ;;  %p1899_p11 = scmp.lt.s32.totalorder %s1897_s23, %s1890_s6 }
  0x65   : > { %p1894_p8 = pneg %p1893_p1 }
  0x66   : > { %p1900_p7 = por %p1899_p11, %p1898_p6 }
  0x68   : > { %p1901_p12 = pnand %p1900_p7, %p1894_p8 }
  0x6a   : > { %1904 = shalt.err (!%p1901_p12)
}
  0x6b   : > { %1676 = dma.hbm_to_vmem [thread:$0]  (!%p2522_p0), %s2180_s25, 128, %s2202_s9, %s2127_s24, %s2521_s13, %s2521_s13, %s2520_s1  }
  0x6c   : > { %p2525_p3 = scmp.ne.s32.totalorder %s2516_s10, 0 }
  0x6d   : > { %p2526_p4 = scmp.eq.s32.totalorder (!%p2525_p3), %s2065_s21, 0 }
  0x6e   : > { %276 = sbr.rel (%p2525_p3) target bundleno = 5861 (0x16e5), region = 36 }
  0x75   : > { %1958 = dma.done.wait (%p2526_p4), [#allocation6], 512   ;;  %p2527_p5 = pmov %p2526_p4 }
  0x76   : > { %s287_s14 = sand.u32 1, %s2065_s21   ;;  %s2239_s29 = sand.u32 1, %s1975_s16  }
  0x77   : > { %1960 = vsyncadd (%p2527_p5), [#allocation6], 4294966784  ;;  %s1498_s7 = sshll.u32 %s2239_s29, 4  ;;  %s288_s12 = scalar_lea.sflag [#allocation9], %s287_s14 }
  0x78   : > { %s291_s8 = scalar_lea.vmem [#allocation8], %s1498_s7  ;;  %p2528_p0 = scmp.ne.s32.totalorder %s2509_s27, 0 }
  0x7a   : > { %1962 = dma.done.wait (%p2528_p0), %s288_s12, 384  }
  0x7b   : > { %1964 = vsyncadd (%p2528_p0), %s288_s12, 4294966912  ;;  %vm356_vm0 = vcmask 125952   ;;  %v1998_v0 = vmov 0.0   ;;  %vm1999_vm1 = vmmov 0   ;;  %vm358_vm2 = vcmask 130048   ;;  %v1746_v2 = vld [vmem:[%s291_s8] sm:$0xff]  }
  0x7c   : > { %1609 = vmatprep.subr.bf16.mxu1 %v1998_v0  ;;  %1611 = vmatprep.mubr.msk.bf16.mxu1 %vm1999_vm1, %v1998_v0  ;;  %v2000_v1 = vmov 0   ;;  %359 = vst.msk [vmem:[#allocation4] sm:$0xff] %vm358_vm2, %v1998_v0  ;;  %s1499_s21 = sshll.u32 %s2239_s29, 3  ;;  %v1747_v3 = vld [vmem:[%s291_s8 + $0x8] sm:$0xff]   ;;  %vm411_vm3 = vcmask 261120   ;;  %v1748_v4 = vld [vmem:[#allocation5] sm:$0xff]  }
  0x7d   : > { %357 = vst.msk [vmem:[#allocation3] sm:$0xf] %vm356_vm0, %v2000_v1  ;;  %1597 = vmatprep.subr.bf16.mxu0 %v1746_v2  ;;  %1601 = vmatprep.mubr.msk.bf16.mxu0 %vm411_vm3, %v1748_v4  ;;  %v1749_v5 = vld [vmem:[#allocation5 + $0x8] sm:$0xff]   ;;  %s300_s27 = scalar_lea.vmem [#allocation10], %s1499_s21  ;;  %v1750_v7 = vld [vmem:[#allocation5 + $0x10] sm:$0xff]   ;;  %v1751_v9 = vld [vmem:[#allocation5 + $0x18] sm:$0xff]  }
  0x7e   : > { %1598 = vmatpush3.bf16.msra.mxu0 %v1746_v2  ;;  %v2254_v6 = vld [vmem:[%s300_s27] sm:$0xff]   ;;  %p343_p10 = scmp.lt.s32.totalorder %s1983_s18, 1  ;;  %vm497_vm4 = vcmask 519168   ;;  %s1564_s1 = smul.u32 28, %s1983_s18 }
  0x7f   : > { %1599 = vmatprep.subr.bf16.mxu0 %v1747_v3  ;;  %1610 = vmatpush3.bf16.msra.mxu1 %v2254_v6  ;;  %s2001_s5 = smov 96   ;;  %s2002_s11 = smov 16  }
  0x80   : > { %1615 = vmatprep.subr.bf16.mxu1 %v1998_v0  ;;  %s344_s24 = scalar_select %p343_p10, %s1983_s18, 1 }
  0x81   : > { %s510_s13 = scalar_lea.vmem [#allocation2], %s1564_s1  ;;  %s2003_s6 = smov 32  }
  0x82   : > { %1600 = vmatpush3.bf16.msra.mxu0 %v1747_v3  ;;  %s345_s25 = scalar_lea.vmem %s2491_s3, %s344_s24  ;;  %s2004_s26 = smov 112  }
  0x83   : > { %1627 = vmatprep.subr.bf16.mxu0 %v1998_v0  ;;  %v1501_v10 = vld [vmem:[%s345_s25] ss:$0 sm:$0xff]  ;;  %v571_v43 = vld [vmem:[#allocation4] sm:$0xff]  ;;  %s2005_s22 = smov 80   ;;  %s1500_s23 = sshll.u32 %s2239_s29, 5 }
  0x84   : > { %v513_v8 = vld [vmem:[#allocation3] sm:$0xf]  ;;  %s2296_s14 = scalar_lea.vmem [#allocation11], %s1500_s23  ;;  %s1517_s12 = smul.u32 20, %s1983_s18 }
  0x85   : > { %1602 = vmatmul.mubr.msk.bf16.vlgmr.msra.gmra.mrb[0].mxu0 %vm411_vm3, %v1749_v5  ;;  %1612 = vmatmul.mubr.msk.bf16.vlgmr.msra.gmra.mrb[0].mxu1 %vm358_vm2, %v513_v8  ;;  %s608_s7 = scalar_lea.vmem %s2296_s14, %s1564_s1 [#allocation11]  ;;  %s1523_s27 = smul.u32 12, %s1983_s18 }
  0x86   : > { %1605 = vmatprep.mubr.msk.bf16.mxu0 %vm411_vm3, %v1750_v7  ;;  %1616 = vmatpush3.bf16.msra.mxu1 %v2254_v6  ;;  %s1369_s8 = scalar_lea.vmem [#allocation2], %s1517_s12  ;;  %s1373_s21 = scalar_lea.vmem %s2296_s14, %s1517_s12 [#allocation11] }
  0x87   : > { %1617 = vmatprep.mubr.msk.bf16.mxu1 %vm1999_vm1, %v1998_v0  ;;  %1621 = vmatprep.subr.bf16.mxu1 %v1998_v0  ;;  %s1377_s24 = scalar_lea.vmem [#allocation2], %s1523_s27  ;;  %s1381_s9 = scalar_lea.vmem %s2296_s14, %s1523_s27 [#allocation11] }
  0x88   : > { %1628 = vmatpush3.bf16.msra.mxu0 %v2254_v6  ;;  %s1529_s10 = sshll.u32 %s1983_s18, 2  ;;  %p2529_p9 = scmp.ne.s32.totalorder %s2510_s28, 0 }
  0x89   : > { %1639 = vmatprep.subr.bf16.mxu0 %v1998_v0  ;;  %s1384_s25 = scalar_lea.vmem [#allocation2], %s1529_s10  ;;  %s1387_s1 = scalar_lea.vmem %s2296_s14, %s1529_s10 [#allocation11] }
  0x8d   : > { %1606 = vmatmul.mubr.msk.bf16.gmra.mrb[4].mxu0 %vm411_vm3, %v1751_v9 }
  0x8e   : > { %1629 = vmatprep.mubr.msk.bf16.mxu0 %vm1999_vm1, %v1998_v0 }
 0x158   : > { %v1603_v11 = vpop.f32.mrb[0].mxu0  ;;  %v558_v14 = vpop.f32.mrb[0].mxu1 }
 0x159   : > { %v467_v12 = vadd.f32 %v1603_v11, %v1501_v10  ;;  %v458_v13 = vpop.f32.mrb[1].mxu0  ;;  %v1613_v17 = vpop.f32.mrb[1].mxu1 }
 0x15a   : > { %v459_v15 = vadd.f32 %v1501_v10, %v458_v13  ;;  %v1604_v16 = vpop.f32.mrb[2].mxu0  ;;  %v561_v21 = vpop.f32.mrb[2].mxu1 }
 0x15b   : > { %v491_v18 = vpack.c.bf16 %v467_v12, %v467_v12  ;;  %v470_v19 = vadd.f32 %v1604_v16, %v1501_v10  ;;  %v461_v20 = vpop.f32.mrb[3].mxu0  ;;  %v1614_v24 = vpop.f32.mrb[3].mxu1 }
 0x15c   : > { %v489_v22 = vpack.c.bf16 %v459_v15, %v459_v15  ;;  %v462_v23 = vadd.f32 %v1501_v10, %v461_v20 }
 0x15d   : > { %500 = vst.msk [vmem:[#allocation2 + $0x8] sm:$0xf] %vm497_vm4, %v491_v18  ;;  %v492_v25 = vpack.c.bf16 %v470_v19, %v470_v19 }
 0x15e   : > { %498 = vst.msk [vmem:[#allocation2] sm:$0xf] %vm497_vm4, %v489_v22  ;;  %v490_v26 = vpack.c.bf16 %v462_v23, %v462_v23 }
 0x15f   : > { %501 = vst.msk [vmem:[#allocation2 + $0xc] sm:$0xf] %vm497_vm4, %v492_v25 }
 0x160   : > { %499 = vst.msk [vmem:[#allocation2 + $0x4] sm:$0xf] %vm497_vm4, %v490_v26  ;;  %v1607_v27 = vpop.f32.mrb[4].mxu0 }
 0x161   : > { %v483_v28 = vadd.f32 %v1607_v27, %v1501_v10  ;;  %v474_v29 = vpop.f32.mrb[5].mxu0 }
 0x162   : > { %v475_v30 = vadd.f32 %v1501_v10, %v474_v29  ;;  %v1608_v31 = vpop.f32.mrb[6].mxu0 }
 0x163   : > { %v495_v32 = vpack.c.bf16 %v483_v28, %v483_v28  ;;  %v486_v33 = vadd.f32 %v1608_v31, %v1501_v10  ;;  %v477_v34 = vpop.f32.mrb[7].mxu0 }
 0x164   : > { %v493_v35 = vpack.c.bf16 %v475_v30, %v475_v30  ;;  %v478_v36 = vadd.f32 %v1501_v10, %v477_v34 }
 0x165   : > { %504 = vst.msk [vmem:[#allocation2 + $0x18] sm:$0xf] %vm497_vm4, %v495_v32  ;;  %v496_v37 = vpack.c.bf16 %v486_v33, %v486_v33 }
 0x166   : > { %502 = vst.msk [vmem:[#allocation2 + $0x10] sm:$0xf] %vm497_vm4, %v493_v35  ;;  %v494_v38 = vpack.c.bf16 %v478_v36, %v478_v36 }
 0x167   : > { %505 = vst.msk [vmem:[#allocation2 + $0x1c] sm:$0xf] %vm497_vm4, %v496_v37 }
 0x168   : > { %503 = vst.msk [vmem:[#allocation2 + $0x14] sm:$0xf] %vm497_vm4, %v494_v38 }
 0x16f   : > { %v511_v39 = vld [vmem:[%s510_s13] sm:$0xf]  ;;  %v1518_v63 = vld [vmem:[%s1369_s8 + $0x4] sm:$0xf]  ;;  %v1524_v28 = vld [vmem:[%s1377_s24 + $0x8] sm:$0xf] }
 0x170   : > { %v512_v40 = vunpack.c.l.bf16 %v511_v39  ;;  %v615_v1 = vunpack.c.l.bf16 %v1518_v63  ;;  %v710_v29 = vunpack.c.l.bf16 %v1524_v28  ;;  %s894_s13 = ssub.s32 4, %s1983_s18  ;;  %s1539_s8 = smul.u32 4294967284, %s1983_s18 }
 0x171   : > { %s2368_s23 = sshll.u32 %s894_s13, 2  ;;  %s1545_s24 = smul.u32 4294967276, %s1983_s18 }
 0x172   : > { %v564_v41 = vadd.f32 %v558_v14, %v512_v40  ;;  %s986_s12 = scalar_lea.vmem %s2296_s14, %s2368_s23 [#allocation11]  ;;  %s1399_s27 = scalar_lea.vmem %s2296_s14, %s1539_s8 [#allocation11] }
 0x173   : > { %s1407_s10 = scalar_lea.vmem %s2296_s14, %s1545_s24 [#allocation11] }
 0x174   : > { %1753 = vtanh.f32 %v564_v41  ;;  %v565_v44 = vsub.f32 0.0, %v564_v41 }
 0x176   : > { %v566_v45 = vmul.f32 1.442695, %v565_v44 }
 0x178   : > { %1755 = vpow2.f32 %v566_v45 }
 0x17e   : > { %v1754_v42 = vpop.eup %1753 }
 0x17f   : > { %578 = vrot.lane.b32.xlu0 %v1754_v42, %s2001_s5 }
 0x182   : > { %v1756_v46 = vpop.eup %1755 }
 0x183   : > { %573 = vrot.lane.b32.xlu0 %v571_v43, %s2002_s11  ;;  %v568_v47 = vadd.f32 1.0, %v1756_v46 }
 0x185   : > { %1757 = vrcp.f32 %v568_v47 }
 0x18f   : > { %v1758_v48 = vpop.eup %1757 }
 0x1f1   : > { %v579_v49 = vpop.permute.xlu0 %578 }
 0x1f2   : > { %v581_v50 = vmul.f32 %v1758_v48, %v579_v49 }
 0x1f4   : > { %583 = vrot.lane.b32.xlu1 %v581_v50, %s2002_s11 }
 0x1f5   : > { %v574_v51 = vpop.permute.xlu0 %573 }
 0x1f6   : > { %v576_v52 = vmul.f32 %v1758_v48, %v574_v51 }
 0x266   : > { %v584_v53 = vpop.permute.xlu1 %583 }
 0x267   : > { %v586_v54 = vadd.f32 %v584_v53, %v576_v52 }
 0x269   : > { %1759 = vtanh.f32 %v586_v54 }
 0x273   : > { %v1760_v55 = vpop.eup %1759 }
 0x274   : > { %589 = vrot.lane.b32.xlu1 %v1760_v55, %s2003_s6  ;;  %v1530_v55 = vld [vmem:[%s1384_s25 + $0xc] sm:$0xf]  ;;  %s1551_s25 = smul.u32 4294967268, %s1983_s18 }
 0x278   : > { %595 = vrot.lane.b32.xlu1 %v586_v54, %s2004_s26 }
 0x2e6   : > { %v590_v56 = vpop.permute.xlu1 %589 }
 0x2e7   : > { %v592_v57 = vmul.f32 %v1758_v48, %v590_v56  ;;  %v804_v56 = vunpack.c.l.bf16 %v1530_v55 }
 0x2e9   : > { %v1565_v58 = vpack.c.bf16 %v592_v57, %v592_v57 }
 0x2ea   : > { %v596_v59 = vpop.permute.xlu1 %595 }
 0x2eb   : > { %598 = vst.msk [vmem:[#allocation4] sm:$0xff] %vm358_vm2, %v596_v59  ;;  %602 = vrot.lane.b32.xlu0 %v1565_v58, %s2005_s22 }
 0x2f2   : > { %v667_v60 = vld [vmem:[#allocation4] sm:$0xff] }
 0x2f3   : > { %669 = vrot.lane.b32.xlu1 %v667_v60, %s2002_s11 }
 0x35d   : > { %v603_v61 = vpop.permute.xlu0 %602 }
 0x35e   : > { %606 = vst.msk [vmem:[#allocation3] sm:$0xf] %vm356_vm0, %v603_v61  ;;  %609 = vst.msk [vmem:[%s608_s7] sm:$0xf] %vm356_vm0, %v603_v61  ;;  %s896_s7 = scalar_lea.vmem [#allocation2], %s2368_s23 }
 0x365   : > { %v616_v62 = vld [vmem:[#allocation3] sm:$0xf]  ;;  %v670_v16 = vpop.permute.xlu1 %669 }
 0x366   : > { %1618 = vmatmul.mubr.msk.bf16.vlgmr.msra.gmra.mrb[4].mxu1 %vm358_vm2, %v616_v62 }
 0x367   : > { %1622 = vmatpush3.bf16.msra.mxu1 %v2254_v6  ;;  %1623 = vmatprep.mubr.msk.bf16.mxu1 %vm1999_vm1, %v1998_v0 }
 0x368   : > { %1633 = vmatprep.subr.bf16.mxu1 %v1998_v0 }
 0x439   : > { %v654_v2 = vpop.f32.mrb[4].mxu1 }
 0x43a   : > { %v660_v3 = vadd.f32 %v654_v2, %v615_v1  ;;  %v1619_v4 = vpop.f32.mrb[5].mxu1 }
 0x43b   : > { %v657_v5 = vpop.f32.mrb[6].mxu1 }
 0x43c   : > { %1761 = vtanh.f32 %v660_v3  ;;  %v1620_v7 = vpop.f32.mrb[7].mxu1  ;;  %v661_v9 = vsub.f32 0.0, %v660_v3 }
 0x43e   : > { %v662_v10 = vmul.f32 1.442695, %v661_v9 }
 0x440   : > { %1763 = vpow2.f32 %v662_v10 }
 0x446   : > { %v1762_v8 = vpop.eup %1761 }
 0x447   : > { %674 = vrot.lane.b32.xlu0 %v1762_v8, %s2001_s5 }
 0x44a   : > { %v1764_v11 = vpop.eup %1763 }
 0x44b   : > { %v664_v12 = vadd.f32 1.0, %v1764_v11 }
 0x44d   : > { %1765 = vrcp.f32 %v664_v12 }
 0x457   : > { %v1766_v13 = vpop.eup %1765 }
 0x458   : > { %v672_v17 = vmul.f32 %v1766_v13, %v670_v16 }
 0x4b9   : > { %v675_v14 = vpop.permute.xlu0 %674 }
 0x4ba   : > { %v677_v15 = vmul.f32 %v1766_v13, %v675_v14 }
 0x4bc   : > { %679 = vrot.lane.b32.xlu0 %v677_v15, %s2002_s11 }
 0x52e   : > { %v680_v18 = vpop.permute.xlu0 %679 }
 0x52f   : > { %v682_v19 = vadd.f32 %v680_v18, %v672_v17 }
 0x531   : > { %1767 = vtanh.f32 %v682_v19 }
 0x53b   : > { %v1768_v20 = vpop.eup %1767 }
 0x53c   : > { %685 = vrot.lane.b32.xlu1 %v1768_v20, %s2003_s6  ;;  %v897_v20 = vld [vmem:[%s896_s7] sm:$0xf] }
 0x540   : > { %691 = vrot.lane.b32.xlu1 %v682_v19, %s2004_s26 }
 0x5ae   : > { %v686_v21 = vpop.permute.xlu1 %685 }
 0x5af   : > { %v688_v22 = vmul.f32 %v1766_v13, %v686_v21  ;;  %v898_v21 = vunpack.c.l.bf16 %v897_v20 }
 0x5b1   : > { %v1567_v23 = vpack.c.bf16 %v688_v22, %v688_v22 }
 0x5b2   : > { %v692_v24 = vpop.permute.xlu1 %691 }
 0x5b3   : > { %694 = vst.msk [vmem:[#allocation4] sm:$0xff] %vm358_vm2, %v692_v24  ;;  %698 = vrot.lane.b32.xlu0 %v1567_v23, %s2005_s22 }
 0x5ba   : > { %v762_v25 = vld [vmem:[#allocation4] sm:$0xff] }
 0x5bb   : > { %764 = vrot.lane.b32.xlu1 %v762_v25, %s2002_s11 }
 0x625   : > { %v699_v26 = vpop.permute.xlu0 %698 }
 0x626   : > { %701 = vst.msk [vmem:[#allocation3] sm:$0xf] %vm356_vm0, %v699_v26  ;;  %1522 = vst.msk [vmem:[%s1373_s21 + $0x4] sm:$0xf] %vm356_vm0, %v699_v26  ;;  %s1395_s21 = scalar_lea.vmem [#allocation2], %s1539_s8 }
 0x62d   : > { %v711_v27 = vld [vmem:[#allocation3] sm:$0xf]  ;;  %v765_v43 = vpop.permute.xlu1 %764 }
 0x62e   : > { %1624 = vmatmul.mubr.msk.bf16.vlgmr.msra.gmra.mrb[8].mxu1 %vm358_vm2, %v711_v27 }
 0x62f   : > { %1634 = vmatpush3.bf16.msra.mxu1 %v2254_v6  ;;  %1635 = vmatprep.mubr.msk.bf16.mxu1 %vm1999_vm1, %v1998_v0 }
 0x630   : > { %1645 = vmatprep.subr.bf16.mxu1 %v1998_v0 }
 0x701   : > { %v749_v30 = vpop.f32.mrb[8].mxu1 }
 0x702   : > { %v755_v31 = vadd.f32 %v749_v30, %v710_v29  ;;  %v1625_v32 = vpop.f32.mrb[9].mxu1 }
 0x703   : > { %v752_v33 = vpop.f32.mrb[10].mxu1 }
 0x704   : > { %1769 = vtanh.f32 %v755_v31  ;;  %v1626_v34 = vpop.f32.mrb[11].mxu1  ;;  %v756_v36 = vsub.f32 0.0, %v755_v31 }
 0x706   : > { %v757_v37 = vmul.f32 1.442695, %v756_v36 }
 0x708   : > { %1771 = vpow2.f32 %v757_v37 }
 0x70e   : > { %v1770_v35 = vpop.eup %1769 }
 0x70f   : > { %769 = vrot.lane.b32.xlu0 %v1770_v35, %s2001_s5 }
 0x712   : > { %v1772_v38 = vpop.eup %1771 }
 0x713   : > { %v759_v39 = vadd.f32 1.0, %v1772_v38 }
 0x715   : > { %1773 = vrcp.f32 %v759_v39 }
 0x71f   : > { %v1774_v40 = vpop.eup %1773 }
 0x720   : > { %v767_v44 = vmul.f32 %v1774_v40, %v765_v43 }
 0x781   : > { %v770_v41 = vpop.permute.xlu0 %769 }
 0x782   : > { %v772_v42 = vmul.f32 %v1774_v40, %v770_v41 }
 0x784   : > { %774 = vrot.lane.b32.xlu0 %v772_v42, %s2002_s11 }
 0x7f6   : > { %v775_v45 = vpop.permute.xlu0 %774 }
 0x7f7   : > { %v777_v46 = vadd.f32 %v775_v45, %v767_v44 }
 0x7f9   : > { %1775 = vtanh.f32 %v777_v46 }
 0x803   : > { %v1776_v47 = vpop.eup %1775 }
 0x804   : > { %780 = vrot.lane.b32.xlu1 %v1776_v47, %s2003_s6  ;;  %v1540_v47 = vld [vmem:[%s1395_s21 + $0x14] sm:$0xf] }
 0x808   : > { %786 = vrot.lane.b32.xlu1 %v777_v46, %s2004_s26 }
 0x876   : > { %v781_v48 = vpop.permute.xlu1 %780 }
 0x877   : > { %v783_v49 = vmul.f32 %v1774_v40, %v781_v48  ;;  %v993_v48 = vunpack.c.l.bf16 %v1540_v47 }
 0x879   : > { %v1568_v50 = vpack.c.bf16 %v783_v49, %v783_v49 }
 0x87a   : > { %v787_v51 = vpop.permute.xlu1 %786 }
 0x87b   : > { %789 = vst.msk [vmem:[#allocation4] sm:$0xff] %vm358_vm2, %v787_v51  ;;  %793 = vrot.lane.b32.xlu0 %v1568_v50, %s2005_s22 }
 0x882   : > { %v856_v52 = vld [vmem:[#allocation4] sm:$0xff] }
 0x883   : > { %858 = vrot.lane.b32.xlu1 %v856_v52, %s2002_s11 }
 0x8ed   : > { %v794_v53 = vpop.permute.xlu0 %793 }
 0x8ee   : > { %796 = vst.msk [vmem:[#allocation3] sm:$0xf] %vm356_vm0, %v794_v53  ;;  %1528 = vst.msk [vmem:[%s1381_s9 + $0x8] sm:$0xf] %vm356_vm0, %v794_v53  ;;  %s1403_s9 = scalar_lea.vmem [#allocation2], %s1545_s24 }
 0x8f5   : > { %v805_v54 = vld [vmem:[#allocation3] sm:$0xf]  ;;  %v859_v8 = vpop.permute.xlu1 %858 }
 0x8f6   : > { %1630 = vmatmul.mubr.msk.bf16.vlgmr.msra.gmra.mrb[8].mxu0 %vm358_vm2, %v805_v54 }
 0x8f7   : > { %1640 = vmatpush3.bf16.msra.mxu0 %v2254_v6  ;;  %1641 = vmatprep.mubr.msk.bf16.mxu0 %vm1999_vm1, %v1998_v0 }
 0x8f8   : > { %1651 = vmatprep.subr.bf16.mxu0 %v1998_v0 }
 0x9c9   : > { %v843_v57 = vpop.f32.mrb[8].mxu0 }
 0x9ca   : > { %v849_v58 = vadd.f32 %v843_v57, %v804_v56  ;;  %v1631_v59 = vpop.f32.mrb[9].mxu0 }
 0x9cb   : > { %v846_v60 = vpop.f32.mrb[10].mxu0 }
 0x9cc   : > { %1777 = vtanh.f32 %v849_v58  ;;  %v1632_v61 = vpop.f32.mrb[11].mxu0  ;;  %v850_v63 = vsub.f32 0.0, %v849_v58 }
 0x9ce   : > { %v851_v1 = vmul.f32 1.442695, %v850_v63 }
 0x9d0   : > { %1779 = vpow2.f32 %v851_v1 }
 0x9d6   : > { %v1778_v62 = vpop.eup %1777 }
 0x9d7   : > { %863 = vrot.lane.b32.xlu0 %v1778_v62, %s2001_s5 }
 0x9da   : > { %v1780_v2 = vpop.eup %1779 }
 0x9db   : > { %v853_v3 = vadd.f32 1.0, %v1780_v2 }
 0x9dd   : > { %1781 = vrcp.f32 %v853_v3 }
 0x9e7   : > { %v1782_v4 = vpop.eup %1781 }
 0x9e8   : > { %v861_v9 = vmul.f32 %v1782_v4, %v859_v8 }
 0xa49   : > { %v864_v5 = vpop.permute.xlu0 %863 }
 0xa4a   : > { %v866_v7 = vmul.f32 %v1782_v4, %v864_v5 }
 0xa4c   : > { %868 = vrot.lane.b32.xlu0 %v866_v7, %s2002_s11 }
 0xabe   : > { %v869_v10 = vpop.permute.xlu0 %868 }
 0xabf   : > { %v871_v11 = vadd.f32 %v869_v10, %v861_v9  ;;  %v1546_v10 = vld [vmem:[%s1403_s9 + $0x18] sm:$0xf] }
 0xac1   : > { %1783 = vtanh.f32 %v871_v11 }
 0xacb   : > { %v1784_v12 = vpop.eup %1783 }
 0xacc   : > { %874 = vrot.lane.b32.xlu1 %v1784_v12, %s2003_s6 }
 0xad0   : > { %880 = vrot.lane.b32.xlu1 %v871_v11, %s2004_s26  ;;  %v1088_v11 = vunpack.c.l.bf16 %v1546_v10 }
 0xb3e   : > { %v875_v13 = vpop.permute.xlu1 %874 }
 0xb3f   : > { %v877_v14 = vmul.f32 %v1782_v4, %v875_v13 }
 0xb41   : > { %v1569_v15 = vpack.c.bf16 %v877_v14, %v877_v14 }
 0xb42   : > { %v881_v16 = vpop.permute.xlu1 %880 }
 0xb43   : > { %883 = vst.msk [vmem:[#allocation4] sm:$0xff] %vm358_vm2, %v881_v16  ;;  %887 = vrot.lane.b32.xlu0 %v1569_v15, %s2005_s22 }
 0xb4a   : > { %v950_v17 = vld [vmem:[#allocation4] sm:$0xff] }
 0xb4b   : > { %952 = vrot.lane.b32.xlu1 %v950_v17, %s2002_s11 }
 0xbb5   : > { %v888_v18 = vpop.permute.xlu0 %887 }
 0xbb6   : > { %890 = vst.msk [vmem:[#allocation3] sm:$0xf] %vm356_vm0, %v888_v18  ;;  %1534 = vst.msk [vmem:[%s1387_s1 + $0xc] sm:$0xf] %vm356_vm0, %v888_v18  ;;  %s1411_s1 = scalar_lea.vmem [#allocation2], %s1551_s25 }
 0xbbd   : > { %v899_v19 = vld [vmem:[#allocation3] sm:$0xf]  ;;  %v953_v35 = vpop.permute.xlu1 %952 }
 0xbbe   : > { %1636 = vmatmul.mubr.msk.bf16.vlgmr.msra.gmra.mrb[12].mxu1 %vm358_vm2, %v899_v19 }
 0xbbf   : > { %1646 = vmatpush3.bf16.msra.mxu1 %v2254_v6  ;;  %1647 = vmatprep.mubr.msk.bf16.mxu1 %vm1999_vm1, %v1998_v0 }
 0xc91   : > { %v937_v22 = vpop.f32.mrb[12].mxu1 }
 0xc92   : > { %v943_v23 = vadd.f32 %v937_v22, %v898_v21  ;;  %v1637_v24 = vpop.f32.mrb[13].mxu1 }
 0xc93   : > { %v940_v25 = vpop.f32.mrb[14].mxu1 }
 0xc94   : > { %1785 = vtanh.f32 %v943_v23  ;;  %v1638_v26 = vpop.f32.mrb[15].mxu1  ;;  %v944_v28 = vsub.f32 0.0, %v943_v23 }
 0xc96   : > { %v945_v29 = vmul.f32 1.442695, %v944_v28 }
 0xc98   : > { %1787 = vpow2.f32 %v945_v29 }
 0xc9e   : > { %v1786_v27 = vpop.eup %1785 }
 0xc9f   : > { %957 = vrot.lane.b32.xlu0 %v1786_v27, %s2001_s5 }
 0xca2   : > { %v1788_v30 = vpop.eup %1787 }
 0xca3   : > { %v947_v31 = vadd.f32 1.0, %v1788_v30 }
 0xca5   : > { %1789 = vrcp.f32 %v947_v31 }
 0xcaf   : > { %v1790_v32 = vpop.eup %1789 }
 0xcb0   : > { %v955_v36 = vmul.f32 %v1790_v32, %v953_v35 }
 0xd11   : > { %v958_v33 = vpop.permute.xlu0 %957 }
 0xd12   : > { %v960_v34 = vmul.f32 %v1790_v32, %v958_v33 }
 0xd14   : > { %962 = vrot.lane.b32.xlu0 %v960_v34, %s2002_s11 }
 0xd86   : > { %v963_v37 = vpop.permute.xlu0 %962 }
 0xd87   : > { %v965_v38 = vadd.f32 %v963_v37, %v955_v36  ;;  %v1552_v37 = vld [vmem:[%s1411_s1 + $0x1c] sm:$0xf] }
 0xd89   : > { %1791 = vtanh.f32 %v965_v38 }
 0xd93   : > { %v1792_v39 = vpop.eup %1791 }
 0xd94   : > { %968 = vrot.lane.b32.xlu1 %v1792_v39, %s2003_s6 }
 0xd98   : > { %974 = vrot.lane.b32.xlu1 %v965_v38, %s2004_s26  ;;  %v1183_v38 = vunpack.c.l.bf16 %v1552_v37 }
 0xe06   : > { %v969_v40 = vpop.permute.xlu1 %968 }
 0xe07   : > { %v971_v41 = vmul.f32 %v1790_v32, %v969_v40 }
 0xe09   : > { %v1570_v42 = vpack.c.bf16 %v971_v41, %v971_v41 }
 0xe0a   : > { %v975_v43 = vpop.permute.xlu1 %974 }
 0xe0b   : > { %977 = vst.msk [vmem:[#allocation4] sm:$0xff] %vm358_vm2, %v975_v43  ;;  %981 = vrot.lane.b32.xlu0 %v1570_v42, %s2005_s22 }
 0xe12   : > { %v1045_v44 = vld [vmem:[#allocation4] sm:$0xff] }
 0xe13   : > { %1047 = vrot.lane.b32.xlu1 %v1045_v44, %s2002_s11 }
 0xe7d   : > { %v982_v45 = vpop.permute.xlu0 %981 }
 0xe7e   : > { %984 = vst.msk [vmem:[#allocation3] sm:$0xf] %vm356_vm0, %v982_v45  ;;  %987 = vst.msk [vmem:[%s986_s12] sm:$0xf] %vm356_vm0, %v982_v45 }
 0xe85   : > { %v994_v46 = vld [vmem:[#allocation3] sm:$0xf]  ;;  %v1048_v60 = vpop.permute.xlu1 %1047 }
 0xe86   : > { %1642 = vmatmul.mubr.msk.bf16.vlgmr.msra.gmra.mrb[12].mxu0 %vm358_vm2, %v994_v46 }
 0xe87   : > { %1652 = vmatpush3.bf16.msra.mxu0 %v2254_v6  ;;  %1653 = vmatprep.mubr.msk.bf16.mxu0 %vm1999_vm1, %v1998_v0 }
 0xf59   : > { %v1032_v49 = vpop.f32.mrb[12].mxu0 }
 0xf5a   : > { %v1038_v50 = vadd.f32 %v1032_v49, %v993_v48  ;;  %v1643_v51 = vpop.f32.mrb[13].mxu0 }
 0xf5b   : > { %v1035_v52 = vpop.f32.mrb[14].mxu0 }
 0xf5c   : > { %1793 = vtanh.f32 %v1038_v50  ;;  %v1644_v53 = vpop.f32.mrb[15].mxu0  ;;  %v1039_v55 = vsub.f32 0.0, %v1038_v50 }
 0xf5e   : > { %v1040_v56 = vmul.f32 1.442695, %v1039_v55 }
 0xf60   : > { %1795 = vpow2.f32 %v1040_v56 }
 0xf66   : > { %v1794_v54 = vpop.eup %1793 }
 0xf67   : > { %1052 = vrot.lane.b32.xlu0 %v1794_v54, %s2001_s5 }
 0xf6a   : > { %v1796_v6 = vpop.eup %1795 }
 0xf6b   : > { %v1042_v57 = vadd.f32 1.0, %v1796_v6 }
 0xf6d   : > { %1797 = vrcp.f32 %v1042_v57 }
 0xf77   : > { %v1798_v0 = vpop.eup %1797 }
 0xf78   : > { %v1050_v61 = vmul.f32 %v1798_v0, %v1048_v60 }
 0xfd9   : > { %v1053_v58 = vpop.permute.xlu0 %1052 }
 0xfda   : > { %v1055_v59 = vmul.f32 %v1798_v0, %v1053_v58 }
 0xfdc   : > { %1057 = vrot.lane.b32.xlu0 %v1055_v59, %s2002_s11 }
0x104e   : > { %v1058_v62 = vpop.permute.xlu0 %1057 }
0x104f   : > { %v1060_v63 = vadd.f32 %v1058_v62, %v1050_v61 }
0x1051   : > { %1799 = vtanh.f32 %v1060_v63 }
0x105b   : > { %v1800_v1 = vpop.eup %1799 }
0x105c   : > { %1063 = vrot.lane.b32.xlu1 %v1800_v1, %s2003_s6 }
0x1060   : > { %1069 = vrot.lane.b32.xlu1 %v1060_v63, %s2004_s26 }
0x10ce   : > { %v1064_v2 = vpop.permute.xlu1 %1063 }
0x10cf   : > { %v1066_v3 = vmul.f32 %v1798_v0, %v1064_v2 }
0x10d1   : > { %v1571_v4 = vpack.c.bf16 %v1066_v3, %v1066_v3 }
0x10d2   : > { %v1070_v5 = vpop.permute.xlu1 %1069 }
0x10d3   : > { %1072 = vst.msk [vmem:[#allocation4] sm:$0xff] %vm358_vm2, %v1070_v5  ;;  %1076 = vrot.lane.b32.xlu0 %v1571_v4, %s2005_s22 }
0x10da   : > { %v1140_v7 = vld [vmem:[#allocation4] sm:$0xff] }
0x10db   : > { %1142 = vrot.lane.b32.xlu1 %v1140_v7, %s2002_s11 }
0x1145   : > { %v1077_v8 = vpop.permute.xlu0 %1076 }
0x1146   : > { %1079 = vst.msk [vmem:[#allocation3] sm:$0xf] %vm356_vm0, %v1077_v8  ;;  %1544 = vst.msk [vmem:[%s1399_s27 + $0x14] sm:$0xf] %vm356_vm0, %v1077_v8 }
0x114d   : > { %v1089_v9 = vld [vmem:[#allocation3] sm:$0xf]  ;;  %v1143_v25 = vpop.permute.xlu1 %1142 }
0x114e   : > { %1648 = vmatmul.mubr.msk.bf16.vlgmr.msra.gmra.mrb[16].mxu1 %vm358_vm2, %v1089_v9 }
0x1221   : > { %v1127_v12 = vpop.f32.mrb[16].mxu1 }
0x1222   : > { %v1133_v13 = vadd.f32 %v1127_v12, %v1088_v11  ;;  %v1649_v14 = vpop.f32.mrb[17].mxu1 }
0x1223   : > { %v1130_v15 = vpop.f32.mrb[18].mxu1 }
0x1224   : > { %1801 = vtanh.f32 %v1133_v13  ;;  %v1650_v16 = vpop.f32.mrb[19].mxu1  ;;  %v1134_v18 = vsub.f32 0.0, %v1133_v13 }
0x1226   : > { %v1135_v19 = vmul.f32 1.442695, %v1134_v18 }
0x1228   : > { %1803 = vpow2.f32 %v1135_v19 }
0x122e   : > { %v1802_v17 = vpop.eup %1801 }
0x122f   : > { %1147 = vrot.lane.b32.xlu0 %v1802_v17, %s2001_s5 }
0x1232   : > { %v1804_v20 = vpop.eup %1803 }
0x1233   : > { %v1137_v21 = vadd.f32 1.0, %v1804_v20 }
0x1235   : > { %1805 = vrcp.f32 %v1137_v21 }
0x123f   : > { %v1806_v22 = vpop.eup %1805 }
0x1240   : > { %v1145_v26 = vmul.f32 %v1806_v22, %v1143_v25 }
0x12a1   : > { %v1148_v23 = vpop.permute.xlu0 %1147 }
0x12a2   : > { %v1150_v24 = vmul.f32 %v1806_v22, %v1148_v23 }
0x12a4   : > { %1152 = vrot.lane.b32.xlu0 %v1150_v24, %s2002_s11 }
0x1316   : > { %v1153_v27 = vpop.permute.xlu0 %1152 }
0x1317   : > { %v1155_v28 = vadd.f32 %v1153_v27, %v1145_v26 }
0x1319   : > { %1807 = vtanh.f32 %v1155_v28 }
0x1323   : > { %v1808_v29 = vpop.eup %1807 }
0x1324   : > { %1158 = vrot.lane.b32.xlu1 %v1808_v29, %s2003_s6 }
0x1328   : > { %1164 = vrot.lane.b32.xlu1 %v1155_v28, %s2004_s26 }
0x1396   : > { %v1159_v30 = vpop.permute.xlu1 %1158 }
0x1397   : > { %v1161_v31 = vmul.f32 %v1806_v22, %v1159_v30 }
0x1399   : > { %v1572_v32 = vpack.c.bf16 %v1161_v31, %v1161_v31 }
0x139a   : > { %v1165_v33 = vpop.permute.xlu1 %1164 }
0x139b   : > { %1167 = vst.msk [vmem:[#allocation4] sm:$0xff] %vm358_vm2, %v1165_v33  ;;  %1171 = vrot.lane.b32.xlu0 %v1572_v32, %s2005_s22 }
0x13a2   : > { %v1235_v34 = vld [vmem:[#allocation4] sm:$0xff] }
0x13a3   : > { %1237 = vrot.lane.b32.xlu1 %v1235_v34, %s2002_s11 }
0x140d   : > { %v1172_v35 = vpop.permute.xlu0 %1171 }
0x140e   : > { %1174 = vst.msk [vmem:[#allocation3] sm:$0xf] %vm356_vm0, %v1172_v35  ;;  %1550 = vst.msk [vmem:[%s1407_s10 + $0x18] sm:$0xf] %vm356_vm0, %v1172_v35 }
0x1415   : > { %v1184_v36 = vld [vmem:[#allocation3] sm:$0xf]  ;;  %v1238_v52 = vpop.permute.xlu1 %1237 }
0x1416   : > { %1654 = vmatmul.mubr.msk.bf16.vlgmr.msra.gmra.mrb[16].mxu0 %vm358_vm2, %v1184_v36 }
0x14e9   : > { %v1222_v39 = vpop.f32.mrb[16].mxu0 }
0x14ea   : > { %v1228_v40 = vadd.f32 %v1222_v39, %v1183_v38  ;;  %v1655_v41 = vpop.f32.mrb[17].mxu0 }
0x14eb   : > { %v1225_v42 = vpop.f32.mrb[18].mxu0 }
0x14ec   : > { %1809 = vtanh.f32 %v1228_v40  ;;  %v1656_v43 = vpop.f32.mrb[19].mxu0  ;;  %v1229_v45 = vsub.f32 0.0, %v1228_v40 }
0x14ee   : > { %v1230_v46 = vmul.f32 1.442695, %v1229_v45 }
0x14f0   : > { %1811 = vpow2.f32 %v1230_v46 }
0x14f6   : > { %v1810_v44 = vpop.eup %1809 }
0x14f7   : > { %1242 = vrot.lane.b32.xlu0 %v1810_v44, %s2001_s5  ;;  %s1293_s5 = sshll.u32 %s2296_s14, 4  ;;  %s2429_s5 = int_to_ptr.vmem [resolvable:$true] %s1293_s5 }
0x14f8   : > { %s1905_s7 = scalar_lea.vmem %s2429_s5, 512 }
0x14f9   : > { %p1906_p2 = scmp.ne.s32.totalorder %s2429_s5, %s1905_s7 }
0x14fa   : > { %v1812_v47 = vpop.eup %1811 }
0x14fb   : > { %v1232_v48 = vadd.f32 1.0, %v1812_v47  ;;  %p1907_p13 = pnand %p1906_p2, %p2529_p9 }
0x14fd   : > { %1813 = vrcp.f32 %v1232_v48  ;;  %p1908_p1 = pneg %p1907_p13 }
0x1507   : > { %v1814_v49 = vpop.eup %1813 }
0x1508   : > { %v1240_v53 = vmul.f32 %v1814_v49, %v1238_v52 }
0x1569   : > { %v1243_v50 = vpop.permute.xlu0 %1242 }
0x156a   : > { %v1245_v51 = vmul.f32 %v1814_v49, %v1243_v50 }
0x156c   : > { %1247 = vrot.lane.b32.xlu0 %v1245_v51, %s2002_s11  ;;  %s1574_s11 = sshll.u32 %s1983_s18, 9  ;;  %s2006_s18 = smov [#allocation11]  }
0x156d   : > { %s2437_s23 = scalar_lea.hbm %s2492_s4, %s1574_s11  ;;  %s1909_s12 = sshll.u32 %s2006_s18, 4  ;;  %s1910_s12 = int_to_ptr.vmem [resolvable:$false] %s1909_s12 }
0x156e   : > { %p1912_p8 = scmp.lt.s32.totalorder %s2429_s5, %s1910_s12 }
0x15de   : > { %v1248_v54 = vpop.permute.xlu0 %1247 }
0x15df   : > { %v1250_v55 = vadd.f32 %v1248_v54, %v1240_v53 }
0x15e1   : > { %1815 = vtanh.f32 %v1250_v55 }
0x15eb   : > { %v1816_v56 = vpop.eup %1815 }
0x15ec   : > { %1253 = vrot.lane.b32.xlu1 %v1816_v56, %s2003_s6  ;;  %s1415_s6 = scalar_lea.vmem %s2296_s14, %s1551_s25 [#allocation11]  ;;  %s1911_s14 = scalar_lea.vmem %s1910_s12, 1024 }
0x15ed   : > { %p1913_p6 = scmp.lt.s32.totalorder %s1911_s14, %s1905_s7 }
0x15ef   : > { %p1914_p11 = por %p1913_p6, %p1912_p8 }
0x15f0   : > { %1259 = vrot.lane.b32.xlu1 %v1250_v55, %s2004_s26 }
0x15f1   : > { %p1915_p7 = pnand %p1914_p11, %p1908_p1 }
0x165e   : > { %v1254_v6 = vpop.permute.xlu1 %1253 }
0x165f   : > { %v1256_v57 = vmul.f32 %v1814_v49, %v1254_v6 }
0x1661   : > { %v1573_v0 = vpack.c.bf16 %v1256_v57, %v1256_v57 }
0x1662   : > { %v1260_v58 = vpop.permute.xlu1 %1259 }
0x1663   : > { %1262 = vst.msk [vmem:[#allocation4] sm:$0xff] %vm358_vm2, %v1260_v58  ;;  %1266 = vrot.lane.b32.xlu0 %v1573_v0, %s2005_s22  ;;  %s1274_s22 = scalar_lea.sflag [#allocation7], %s2239_s29 }
0x16d5   : > { %v1267_v59 = vpop.permute.xlu0 %1266 }
0x16d6   : > { %1269 = vst.msk [vmem:[#allocation3] sm:$0xf] %vm356_vm0, %v1267_v59  ;;  %1556 = vst.msk [vmem:[%s1415_s6 + $0x1c] sm:$0xf] %vm356_vm0, %v1267_v59 }
0x16d7   : > { %1918 = shalt.err (!%p1915_p7)
}
0x16d8   : > { %s1919_s8 = scalar_lea.hbm %s2437_s23, 512  ;;  %s1923_s24 = scalar_lea.hbm %s2492_s4, 1024 }
0x16d9   : > { %p1920_p12 = scmp.ne.s32.totalorder %s2437_s23, %s1919_s8  ;;  %p1924_p5 = scmp.lt.u32.totalorder %s2437_s23, %s2492_s4 }
0x16da   : > { %p1925_p0 = scmp.lt.u32.totalorder %s1923_s24, %s1919_s8  ;;  %p1927_p2 = scmp.lt.u32.totalorder %s1919_s8, %s2437_s23 }
0x16db   : > { %p1921_p3 = pnand %p1920_p12, %p2529_p9 }
0x16dc   : > { %p1926_p10 = por %p1925_p0, %p1924_p5 }
0x16dd   : > { %p1922_p4 = pneg %p1921_p3 }
0x16de   : > { %p1928_p13 = por %p1927_p2, %p1926_p10 }
0x16e0   : > { %p1929_p1 = pnand %p1928_p13, %p1922_p4 }
0x16e2   : > { %1932 = shalt.err (!%p1929_p1)
}
0x16e3   : > { %s2007_s25 = smov 64   ;;  %s2008_s1 = smov 4  }
0x16e4   : > { %1665 = dma.vmem_to_hbm [thread:$0]  (%p2529_p9), %s2429_s5, 512, %s2437_s23, %s1274_s22, %s2007_s25, %s2007_s25, %s2008_s1  }
0x16e5 PF: > { %s1308_s11 = sand.u32 1, %s1971_s15   ;;  %p2530_p8 = scmp.ne.s32.totalorder %s2512_s30, 0 }
0x16e6   : > { %p2531_p6 = scmp.ge.s32.totalorder %s1991_s20, 2  ;;  %s1309_s6 = scalar_lea.sflag [#allocation7], %s1308_s11 }
0x16e8   : > { %p1678_p11 = pnand %p2531_p6, %p2530_p8 }
0x16ea   : > { %1966 = dma.done.wait (!%p1678_p11), %s1309_s6, 512  }
0x16eb   : > { %1968 = vsyncadd (!%p1678_p11), %s1309_s6, 4294966784  ;;  %s23_s20 = sadd.s32 1, %s1991_s20   ;;  %s2532_s13 = sld [smem:[#allocation16_spill]] }
0x16ec   : > { %p20_p7 = scmp.ge.s32.totalorder %s23_s20, 4   ;;  %s2533_s28 = sld [smem:[#allocation15_spill]] }
0x16ed   : > { %s2534_s15 = smov %s1975_s16  ;;  %s2535_s16 = smov %s1979_s17 }
0x16ee   : > { %s2537_s18 = smov %s1987_s19  ;;  %22 = sbr.rel (!%p20_p7) target bundleno = 10 (0xa), region = 128 }
0x16f1   : > { %s2536_s17 = smov %s2532_s13 }
0x16f2   : > { %s2538_s19 = smov %s2533_s28 }
0x16f5   :  { %1314 = vsyncpa [#allocation6], 1 }
0x16f6   :  { %1316 = vsyncpa [#allocation6 + $0x1], 1 }
0x16f7   :  { %1317 = vsyncpa [#allocation9], 1 }
0x16f8   :  { %1319 = vsyncpa [#allocation9 + $0x1], 1 }
0x16f9   :  { %1320 = vsyncpa [#allocation7], 1 }
0x16fa   :  { %1322 = vsyncpa [#allocation7 + $0x1], 1 }

</bundles_post_ra>
